<compile_context>
chip_gen: v7x
topology: tpu7x:2x2x1
jax: 0.10.0
libtpu: 0.0.40
codegen_flags: <defaults>
</compile_context>

<pallas_src>
import math

import jax
import jax.numpy as jnp
from jax.experimental import pallas as pl
from jax.experimental.pallas import tpu as pltpu

_MIB = 1024 * 1024


def summary_attn_kernel(q_ref, v_ref, mask_ref, w1_ref, b1_ref, w2_ref, b2_ref,
                        alpha_ref, out_ref):
    # q_ref/v_ref: (Bblk, S, D); mask_ref: (Bblk, S); w1: (D, D); b1: (1, D);
    # w2: (D, H); b2: (1, H); alpha: (1, 1) scalar in SMEM.
    # out_ref: (Bblk, D) if D % 128 == 0, else a lane-dense (1, 1, Bblk*D) slab.
    Bblk, S, D = q_ref.shape
    H = w2_ref.shape[1]

    # --- Linear(dim, dim) + PReLU; batch folded into the MXU M dimension ---
    # (Leading-dims-only collapse: the (S, D) minor tile is unchanged, so no relayout.)
    q2d = q_ref[...].reshape(Bblk * S, D)
    h = jnp.dot(q2d, w1_ref[...], preferred_element_type=jnp.float32) + b1_ref[...]
    alpha = alpha_ref[0, 0]                               # scalar from SMEM
    h = jnp.where(h > 0, h, alpha * h)

    # --- Linear(dim, num_attn); keep (Bblk, S, H) layout, no (S,H)->(H,S) transpose ---
    s = jnp.dot(h.astype(w2_ref.dtype), w2_ref[...],
                preferred_element_type=jnp.float32) + b2_ref[...]
    scores = s.reshape(Bblk, S, H)

    # masked_fill(mask == 0, -65504.) as mul+add: exact for a 0/1 mask (incl. the
    # fully-masked-row case) and avoids the compare+select (perf review item).
    m = mask_ref[...][:, :, None]                         # (Bblk, S, 1)
    scores = scores * m + (m - 1.0) * 65504.0

    # --- softmax over the sequence axis ---
    scores = scores - jnp.max(scores, axis=1, keepdims=True)
    e = jnp.exp(scores)
    inv = 1.0 / jnp.sum(e, axis=1, keepdims=True)         # one divide per (b, h) row
    p = e * inv                                           # (Bblk, S, H)

    # --- mean over heads first (matmul is linear), then contract with value ---
    p_mean = jnp.mean(p, axis=2)                          # (Bblk, S)
    out = jnp.sum(p_mean[:, :, None] * v_ref[...], axis=1)   # (Bblk, D)
    # TODO(synk): for large S on v6e/v7x, swap the reduce above for
    # jnp.einsum('bs,bsd->bd', ...) so the MXU (not the 2-XLU reduce path) does the
    # contraction; neutral at these shapes -- gate on S after a bundle dump.
    out = out.astype(out_ref.dtype)

    if len(out_ref.shape) == 2:
        # D is already a multiple of 128 lanes: store the (Bblk, D) tile directly.
        out_ref[...] = out
    else:
        # Lane-dense (1, 1, Bblk*D) slab: unmasked lane-dense writeback. Static
        # row-slice stores instead of a vector reshape (see header note).
        for b in range(Bblk):
            out_ref[0, :, b * D:(b + 1) * D] = out[b:b + 1, :]


def _vmem_capacity_bytes():
    """Per-TensorCore VMEM, queried at trace time; conservative v7x fallback."""
    try:
        cap = int(pltpu.get_tpu_info().vmem_capacity_bytes)
        if cap >= 8 * _MIB:
            return cap
    except Exception:
        pass
    return 64 * _MIB  # v7x per-TC VMEM (smallest current generation)


def _pick_batch_block(B, S, D, H, q_bytes, w_bytes, block_b):
    """Largest batch block whose double-buffered working set fits the VMEM budget."""
    cap = _vmem_capacity_bytes()
    budget = (cap // 4) * 3               # v7x: 48 of 64 MiB; v5e/v6e: 96 of 128 MiB
    # Weights are grid-resident but still double-buffered by the pipeline; 2 MiB of
    # slack covers Mosaic internal scratch and alignment padding.
    fixed = 2 * ((D * D + D) + (D * H + H)) * w_bytes + 2 * _MIB
    per_row = (2 * 2 * S * D * q_bytes    # q, v blocks, double-buffered
               + 2 * S * 4 + 2 * D * 4    # mask + output blocks, double-buffered
               + 3 * S * D * 4            # f32 activations (q2d / h) inside the kernel
               + 4 * S * H * 4)           # scores / exp / p intermediates
    bblk_max = max(1, (budget - fixed) // per_row)

    bblk = max(1, min(bblk_max, B))
    if block_b is not None:
        bblk = max(1, min(bblk, block_b))
    # Align the batch block: sublane-aligned (8) and Bblk*D a multiple of 128 lanes
    # so the flattened output slab is lane-dense.
    mult = math.lcm(8, 128 // math.gcd(D, 128))
    bblk = pl.cdiv(bblk, mult) * mult
    nblk = pl.cdiv(B, bblk)
    if nblk > 1 and nblk % 2 == 1 and nblk < 8:
        # Odd tiny grids leave one of v7x's two TensorCores idle for a whole block.
        nblk += 1
        bblk = pl.cdiv(pl.cdiv(B, nblk), mult) * mult
    vmem_limit = int(min(budget + 8 * _MIB, (cap // 8) * 7))
    return int(bblk), int(nblk), vmem_limit


def summary_attn(query, value, mask, params, *, block_b=None, use_bf16=False):
    """query/value: (B, S, D); mask: (B, S) with 1=keep, 0=masked. Returns (B, D)."""
    B, S, D = query.shape
    H = params["w2"].shape[1]
    mask = mask.astype(jnp.float32)

    w1, w2 = params["w1"], params["w2"]
    if use_bf16:
        # bf16 matmul operands halve q/v/W DMA bytes and are MXU-native on every
        # generation (v5e included -- PReLU/softmax stay on f32 accumulators, so the
        # "no bf16 VPU/EUP" caveat doesn't bite).  Off by default for the 1e-5 check.
        query, value = query.astype(jnp.bfloat16), value.astype(jnp.bfloat16)
        w1, w2 = w1.astype(jnp.bfloat16), w2.astype(jnp.bfloat16)

    Bblk, nblk, vmem_limit = _pick_batch_block(
        B, S, D, H, query.dtype.itemsize, w1.dtype.itemsize, block_b)
    Bpad = nblk * Bblk
    if Bpad != B:
        pad = Bpad - B  # padded rows: zero q/v + zero mask; sliced off below
        query = jnp.pad(query, ((0, pad), (0, 0), (0, 0)))
        value = jnp.pad(value, ((0, pad), (0, 0), (0, 0)))
        mask = jnp.pad(mask, ((0, pad), (0, 0)))

    # Lane-dense output slab when D < 128 (perf review item); capped so the
    # in-kernel row-store unroll stays small.  D % 128 == 0 is already lane-dense.
    flat_out = (D % 128 != 0) and (Bblk <= 256)
    if flat_out:
        out_shape = jax.ShapeDtypeStruct((nblk, 1, Bblk * D), jnp.float32)
        out_spec = pl.BlockSpec((1, 1, Bblk * D), lambda b: (b, 0, 0))
    else:
        out_shape = jax.ShapeDtypeStruct((Bpad, D), jnp.float32)
        out_spec = pl.BlockSpec((Bblk, D), lambda b: (b, 0))

    out = pl.pallas_call(
        summary_attn_kernel,
        out_shape=out_shape,
        grid=(nblk,),
        in_specs=[
            pl.BlockSpec((Bblk, S, D), lambda b: (b, 0, 0)),    # query
            pl.BlockSpec((Bblk, S, D), lambda b: (b, 0, 0)),    # value
            pl.BlockSpec((Bblk, S), lambda b: (b, 0)),          # mask
            # Grid-resident weights (constant block index).  The VMEM budget above
            # charges them double-buffered; pipeline_mode=pl.Buffered(1) would
            # reclaim half of that on v7x once single-buffering is confirmed, and
            # pl.Buffered(3) on q/v is the knob if DMA is exposed on v6e at large S*D.
            pl.BlockSpec((D, D), lambda b: (0, 0)),             # W1^T
            pl.BlockSpec((1, D), lambda b: (0, 0)),             # b1
            pl.BlockSpec((D, H), lambda b: (0, 0)),             # W2^T
            pl.BlockSpec((1, H), lambda b: (0, 0)),             # b2
            pl.BlockSpec(memory_space=pltpu.MemorySpace.SMEM),  # PReLU alpha scalar
        ],
        out_specs=out_spec,
        compiler_params=pltpu.CompilerParams(
            dimension_semantics=("parallel",),  # batch grid shards over v7x's 2 TCs
            vmem_limit_bytes=vmem_limit,        # per-generation (v7x ~56 MiB, v5e/v6e ~104 MiB)
        ),
    )(query, value, mask, w1, params["b1"], w2, params["b2"], params["alpha"])

    out = out.reshape(Bpad, D) if flat_out else out
    return out[:B]


def summary_attn_ref(query, value, mask, params):
    """Pure-JAX reference matching the PyTorch module (eval mode)."""
    h = query @ params["w1"] + params["b1"]
    a = params["alpha"][0, 0]
    h = jnp.where(h > 0, h, a * h)
    scores = (h @ params["w2"] + params["b2"]).transpose(0, 2, 1)  # (B, H, S)
    m = mask[:, None, :]
    scores = jnp.where(m == 0.0, -65504.0, scores)
    p = jax.nn.softmax(scores, axis=-1)
    weighted = p @ value            # (B, H, D)
    return weighted.mean(axis=-2)   # (B, D)


def init_params(key, dim, num_attn):
    k1, k2, k3, k4 = jax.random.split(key, 4)
    scale1 = 1.0 / jnp.sqrt(dim)
    # Weights stored already transposed: y = x @ W^T + b  ->  x @ w + b
    w1 = jax.random.uniform(k1, (dim, dim), jnp.float32, -scale1, scale1)
    b1 = jax.random.uniform(k2, (1, dim), jnp.float32, -scale1, scale1)
    w2 = jax.random.uniform(k3, (dim, num_attn), jnp.float32, -scale1, scale1)
    b2 = jax.random.uniform(k4, (1, num_attn), jnp.float32, -scale1, scale1)
    alpha = jnp.full((1, 1), 0.25, jnp.float32)  # nn.PReLU() default init
    return {"w1": w1, "b1": b1, "w2": w2, "b2": b2, "alpha": alpha}


if __name__ == "__main__":
    B, S, D, H = 20, 8, 32, 4  # batch, seq, dim, num_attn

    key = jax.random.PRNGKey(0)
    kq, kv, kp = jax.random.split(key, 3)
    query = jax.random.normal(kq, (B, S, D), jnp.float32)
    value = jax.random.normal(kv, (B, S, D), jnp.float32)
    # mask: 1 = keep, 0 = masked
    mask = jnp.ones((B, S), jnp.float32)
    mask = mask.at[1, -2:].set(0.0).at[7, :3].set(0.0).at[13, 4:].set(0.0)

    params = init_params(kp, D, H)
    ref = summary_attn_ref(query, value, mask, params)

    # 1) Auto-sized run: whole batch fits VMEM -> a single grid step (fast path).
    out = jax.block_until_ready(summary_attn(query, value, mask, params))
    assert out.shape == (B, D)
    assert jnp.allclose(out, ref, atol=1e-5, rtol=1e-5), (
        f"auto-block: max abs err {jnp.max(jnp.abs(out - ref))}")

    # 2) Forced small block: exercises the multi-block grid, batch padding, and the
    #    even-nblk (v7x 2-TC balance) logic.
    out_mb = jax.block_until_ready(
        summary_attn(query, value, mask, params, block_b=8))
    assert jnp.allclose(out_mb, ref, atol=1e-5, rtol=1e-5), (
        f"multi-block: max abs err {jnp.max(jnp.abs(out_mb - ref))}")

    # 3) bf16 operand path (recommended on v5e/v6e/v7x when tolerance allows).
    out_bf16 = jax.block_until_ready(
        summary_attn(query, value, mask, params, use_bf16=True))
    assert jnp.allclose(out_bf16, ref, atol=5e-2, rtol=5e-2), (
        f"bf16: max abs err {jnp.max(jnp.abs(out_bf16 - ref))}")

    print("KERNEL_OK")
</pallas_src>

<mosaic_0001>
module attributes {stable_mosaic.version = 11 : i64} {
  func.func @summary_attn_kernel(%arg0: i32, %arg1: memref<24x8x32xf32, #tpu.memory_space<vmem>>, %arg2: memref<24x8x32xf32, #tpu.memory_space<vmem>>, %arg3: memref<24x8xf32, #tpu.memory_space<vmem>>, %arg4: memref<32x32xf32, #tpu.memory_space<vmem>>, %arg5: memref<1x32xf32, #tpu.memory_space<vmem>>, %arg6: memref<32x4xf32, #tpu.memory_space<vmem>>, %arg7: memref<1x4xf32, #tpu.memory_space<vmem>>, %arg8: memref<1x1xf32, #tpu.memory_space<smem>>, %arg9: memref<1x1x768xf32, #tpu.memory_space<vmem>>) attributes {dimension_semantics = [#tpu.dimension_semantics<parallel>], iteration_bounds = array<i64: 1>, scalar_prefetch = 0 : i64, scratch_operands = 0 : i64, tpu.core_type = #tpu.core_type<tc>, window_params = [{transform_indices = @transform_0, window_bounds = array<i64: 24, 8, 32>}, {transform_indices = @transform_1, window_bounds = array<i64: 24, 8, 32>}, {transform_indices = @transform_2, window_bounds = array<i64: 24, 8>}, {pipeline_mode = #tpu.pipeline_mode<synchronous>, transform_indices = @transform_3, window_bounds = array<i64: 32, 32>}, {pipeline_mode = #tpu.pipeline_mode<synchronous>, transform_indices = @transform_4, window_bounds = array<i64: 1, 32>}, {pipeline_mode = #tpu.pipeline_mode<synchronous>, transform_indices = @transform_5, window_bounds = array<i64: 32, 4>}, {pipeline_mode = #tpu.pipeline_mode<synchronous>, transform_indices = @transform_6, window_bounds = array<i64: 1, 4>}, {transform_indices = @transform_7, window_bounds = array<i64: 1, 1>}, {transform_indices = @transform_8, window_bounds = array<i64: 1, 1, 768>}]} {
    %c0 = arith.constant 0 : index
    %c0_0 = arith.constant 0 : index
    %c0_1 = arith.constant 0 : index
    %0 = vector.load %arg1[%c0, %c0_0, %c0_1] : memref<24x8x32xf32, #tpu.memory_space<vmem>>, vector<24x8x32xf32>
    %1 = vector.shape_cast %0 : vector<24x8x32xf32> to vector<192x32xf32>
    %c0_2 = arith.constant 0 : index
    %c0_3 = arith.constant 0 : index
    %2 = vector.load %arg4[%c0_2, %c0_3] : memref<32x32xf32, #tpu.memory_space<vmem>>, vector<32x32xf32>
    %cst = arith.constant dense<0.000000e+00> : vector<192x32xf32>
    %3 = tpu.matmul %1, %2, %cst {dimension_numbers = #tpu.dot_dimension_numbers<[1], [0], [0], [1], [0, 0, 1, 1], [], []>} : vector<192x32xf32>, vector<32x32xf32>, vector<192x32xf32> -> vector<192x32xf32>
    %c0_4 = arith.constant 0 : index
    %c0_5 = arith.constant 0 : index
    %4 = vector.load %arg5[%c0_4, %c0_5] : memref<1x32xf32, #tpu.memory_space<vmem>>, vector<1x32xf32>
    %5 = vector.broadcast %4 : vector<1x32xf32> to vector<192x32xf32>
    %6 = arith.addf %3, %5 : vector<192x32xf32>
    %c0_6 = arith.constant 0 : index
    %c0_7 = arith.constant 0 : index
    %7 = memref.load %arg8[%c0_6, %c0_7] : memref<1x1xf32, #tpu.memory_space<smem>>
    %cst_8 = arith.constant 0.000000e+00 : f32
    %8 = vector.broadcast %cst_8 : f32 to vector<192x32xf32>
    %9 = arith.cmpf ogt, %6, %8 : vector<192x32xf32>
    %10 = vector.broadcast %7 : f32 to vector<192x32xf32>
    %11 = arith.mulf %10, %6 : vector<192x32xf32>
    %12 = arith.select %9, %6, %11 : vector<192x32xi1>, vector<192x32xf32>
    %c0_9 = arith.constant 0 : index
    %c0_10 = arith.constant 0 : index
    %13 = vector.load %arg6[%c0_9, %c0_10] : memref<32x4xf32, #tpu.memory_space<vmem>>, vector<32x4xf32>
    %cst_11 = arith.constant dense<0.000000e+00> : vector<192x4xf32>
    %14 = tpu.matmul %12, %13, %cst_11 {dimension_numbers = #tpu.dot_dimension_numbers<[1], [0], [0], [1], [0, 0, 1, 1], [], []>} : vector<192x32xf32>, vector<32x4xf32>, vector<192x4xf32> -> vector<192x4xf32>
    %c0_12 = arith.constant 0 : index
    %c0_13 = arith.constant 0 : index
    %15 = vector.load %arg7[%c0_12, %c0_13] : memref<1x4xf32, #tpu.memory_space<vmem>>, vector<1x4xf32>
    %16 = vector.broadcast %15 : vector<1x4xf32> to vector<192x4xf32>
    %17 = arith.addf %14, %16 : vector<192x4xf32>
    %18 = vector.shape_cast %17 : vector<192x4xf32> to vector<24x8x4xf32>
    %c0_14 = arith.constant 0 : index
    %c0_15 = arith.constant 0 : index
    %19 = vector.load %arg3[%c0_14, %c0_15] : memref<24x8xf32, #tpu.memory_space<vmem>>, vector<24x8xf32>
    %20 = vector.shape_cast %19 : vector<24x8xf32> to vector<24x8x1xf32>
    %21 = vector.broadcast %20 : vector<24x8x1xf32> to vector<24x8x4xf32>
    %22 = arith.mulf %18, %21 : vector<24x8x4xf32>
    %cst_16 = arith.constant 1.000000e+00 : f32
    %23 = vector.broadcast %cst_16 : f32 to vector<24x8x1xf32>
    %24 = arith.subf %20, %23 : vector<24x8x1xf32>
    %cst_17 = arith.constant 6.550400e+04 : f32
    %25 = vector.broadcast %cst_17 : f32 to vector<24x8x1xf32>
    %26 = arith.mulf %24, %25 : vector<24x8x1xf32>
    %27 = vector.broadcast %26 : vector<24x8x1xf32> to vector<24x8x4xf32>
    %28 = arith.addf %22, %27 : vector<24x8x4xf32>
    %cst_18 = arith.constant dense<0xFF800000> : vector<24x4xf32>
    %29 = vector.multi_reduction <maximumf>, %28, %cst_18 [1] : vector<24x8x4xf32> to vector<24x4xf32>
    %30 = vector.shape_cast %29 : vector<24x4xf32> to vector<24x1x4xf32>
    %31 = vector.broadcast %30 : vector<24x1x4xf32> to vector<24x8x4xf32>
    %32 = arith.subf %28, %31 : vector<24x8x4xf32>
    %33 = math.exp %32 : vector<24x8x4xf32>
    %cst_19 = arith.constant dense<0.000000e+00> : vector<24x4xf32>
    %34 = vector.multi_reduction <add>, %33, %cst_19 [1] : vector<24x8x4xf32> to vector<24x4xf32>
    %35 = vector.shape_cast %34 : vector<24x4xf32> to vector<24x1x4xf32>
    %cst_20 = arith.constant 1.000000e+00 : f32
    %36 = vector.broadcast %cst_20 : f32 to vector<24x1x4xf32>
    %37 = arith.divf %36, %35 : vector<24x1x4xf32>
    %38 = vector.broadcast %37 : vector<24x1x4xf32> to vector<24x8x4xf32>
    %39 = arith.mulf %33, %38 : vector<24x8x4xf32>
    %cst_21 = arith.constant dense<0.000000e+00> : vector<24x8xf32>
    %40 = vector.multi_reduction <add>, %39, %cst_21 [2] : vector<24x8x4xf32> to vector<24x8xf32>
    %cst_22 = arith.constant 4.000000e+00 : f32
    %41 = vector.broadcast %cst_22 : f32 to vector<24x8xf32>
    %42 = arith.divf %40, %41 : vector<24x8xf32>
    %43 = vector.shape_cast %42 : vector<24x8xf32> to vector<24x8x1xf32>
    %c0_23 = arith.constant 0 : index
    %c0_24 = arith.constant 0 : index
    %c0_25 = arith.constant 0 : index
    %44 = vector.load %arg2[%c0_23, %c0_24, %c0_25] : memref<24x8x32xf32, #tpu.memory_space<vmem>>, vector<24x8x32xf32>
    %45 = vector.broadcast %43 : vector<24x8x1xf32> to vector<24x8x32xf32>
    %46 = arith.mulf %45, %44 : vector<24x8x32xf32>
    %cst_26 = arith.constant dense<0.000000e+00> : vector<24x32xf32>
    %47 = vector.multi_reduction <add>, %46, %cst_26 [1] : vector<24x8x32xf32> to vector<24x32xf32>
    %48 = vector.extract_strided_slice %47 {offsets = [0, 0], sizes = [1, 32], strides = [1, 1]} : vector<24x32xf32> to vector<1x32xf32>
    %c0_27 = arith.constant 0 : index
    %c0_28 = arith.constant 0 : index
    %c0_29 = arith.constant 0 : index
    %49 = vector.load %arg9[%c0_27, %c0_28, %c0_29] : memref<1x1x768xf32, #tpu.memory_space<vmem>>, vector<1x1x32xf32>
    %50 = vector.shape_cast %49 : vector<1x1x32xf32> to vector<1x32xf32>
    %51 = vector.shape_cast %48 : vector<1x32xf32> to vector<1x1x32xf32>
    tpu.vector_store %arg9[%c0_27, %c0_28, %c0_29], %51 {strides = array<i32>} : memref<1x1x768xf32, #tpu.memory_space<vmem>>, vector<1x1x32xf32>,
    %52 = vector.extract_strided_slice %47 {offsets = [1, 0], sizes = [1, 32], strides = [1, 1]} : vector<24x32xf32> to vector<1x32xf32>
    %c0_30 = arith.constant 0 : index
    %c0_31 = arith.constant 0 : index
    %c32 = arith.constant 32 : index
    %53 = vector.load %arg9[%c0_30, %c0_31, %c32] : memref<1x1x768xf32, #tpu.memory_space<vmem>>, vector<1x1x32xf32>
    %54 = vector.shape_cast %53 : vector<1x1x32xf32> to vector<1x32xf32>
    %55 = vector.shape_cast %52 : vector<1x32xf32> to vector<1x1x32xf32>
    tpu.vector_store %arg9[%c0_30, %c0_31, %c32], %55 {strides = array<i32>} : memref<1x1x768xf32, #tpu.memory_space<vmem>>, vector<1x1x32xf32>,
    %56 = vector.extract_strided_slice %47 {offsets = [2, 0], sizes = [1, 32], strides = [1, 1]} : vector<24x32xf32> to vector<1x32xf32>
    %c0_32 = arith.constant 0 : index
    %c0_33 = arith.constant 0 : index
    %c64 = arith.constant 64 : index
    %57 = vector.load %arg9[%c0_32, %c0_33, %c64] : memref<1x1x768xf32, #tpu.memory_space<vmem>>, vector<1x1x32xf32>
    %58 = vector.shape_cast %57 : vector<1x1x32xf32> to vector<1x32xf32>
    %59 = vector.shape_cast %56 : vector<1x32xf32> to vector<1x1x32xf32>
    tpu.vector_store %arg9[%c0_32, %c0_33, %c64], %59 {strides = array<i32>} : memref<1x1x768xf32, #tpu.memory_space<vmem>>, vector<1x1x32xf32>,
    %60 = vector.extract_strided_slice %47 {offsets = [3, 0], sizes = [1, 32], strides = [1, 1]} : vector<24x32xf32> to vector<1x32xf32>
    %c0_34 = arith.constant 0 : index
    %c0_35 = arith.constant 0 : index
    %c96 = arith.constant 96 : index
    %61 = vector.load %arg9[%c0_34, %c0_35, %c96] : memref<1x1x768xf32, #tpu.memory_space<vmem>>, vector<1x1x32xf32>
    %62 = vector.shape_cast %61 : vector<1x1x32xf32> to vector<1x32xf32>
    %63 = vector.shape_cast %60 : vector<1x32xf32> to vector<1x1x32xf32>
    tpu.vector_store %arg9[%c0_34, %c0_35, %c96], %63 {strides = array<i32>} : memref<1x1x768xf32, #tpu.memory_space<vmem>>, vector<1x1x32xf32>,
    %64 = vector.extract_strided_slice %47 {offsets = [4, 0], sizes = [1, 32], strides = [1, 1]} : vector<24x32xf32> to vector<1x32xf32>
    %c0_36 = arith.constant 0 : index
    %c0_37 = arith.constant 0 : index
    %c128 = arith.constant 128 : index
    %65 = vector.load %arg9[%c0_36, %c0_37, %c128] : memref<1x1x768xf32, #tpu.memory_space<vmem>>, vector<1x1x32xf32>
    %66 = vector.shape_cast %65 : vector<1x1x32xf32> to vector<1x32xf32>
    %67 = vector.shape_cast %64 : vector<1x32xf32> to vector<1x1x32xf32>
    tpu.vector_store %arg9[%c0_36, %c0_37, %c128], %67 {strides = array<i32>} : memref<1x1x768xf32, #tpu.memory_space<vmem>>, vector<1x1x32xf32>,
    %68 = vector.extract_strided_slice %47 {offsets = [5, 0], sizes = [1, 32], strides = [1, 1]} : vector<24x32xf32> to vector<1x32xf32>
    %c0_38 = arith.constant 0 : index
    %c0_39 = arith.constant 0 : index
    %c160 = arith.constant 160 : index
    %69 = vector.load %arg9[%c0_38, %c0_39, %c160] : memref<1x1x768xf32, #tpu.memory_space<vmem>>, vector<1x1x32xf32>
    %70 = vector.shape_cast %69 : vector<1x1x32xf32> to vector<1x32xf32>
    %71 = vector.shape_cast %68 : vector<1x32xf32> to vector<1x1x32xf32>
    tpu.vector_store %arg9[%c0_38, %c0_39, %c160], %71 {strides = array<i32>} : memref<1x1x768xf32, #tpu.memory_space<vmem>>, vector<1x1x32xf32>,
    %72 = vector.extract_strided_slice %47 {offsets = [6, 0], sizes = [1, 32], strides = [1, 1]} : vector<24x32xf32> to vector<1x32xf32>
    %c0_40 = arith.constant 0 : index
    %c0_41 = arith.constant 0 : index
    %c192 = arith.constant 192 : index
    %73 = vector.load %arg9[%c0_40, %c0_41, %c192] : memref<1x1x768xf32, #tpu.memory_space<vmem>>, vector<1x1x32xf32>
    %74 = vector.shape_cast %73 : vector<1x1x32xf32> to vector<1x32xf32>
    %75 = vector.shape_cast %72 : vector<1x32xf32> to vector<1x1x32xf32>
    tpu.vector_store %arg9[%c0_40, %c0_41, %c192], %75 {strides = array<i32>} : memref<1x1x768xf32, #tpu.memory_space<vmem>>, vector<1x1x32xf32>,
    %76 = vector.extract_strided_slice %47 {offsets = [7, 0], sizes = [1, 32], strides = [1, 1]} : vector<24x32xf32> to vector<1x32xf32>
    %c0_42 = arith.constant 0 : index
    %c0_43 = arith.constant 0 : index
    %c224 = arith.constant 224 : index
    %77 = vector.load %arg9[%c0_42, %c0_43, %c224] : memref<1x1x768xf32, #tpu.memory_space<vmem>>, vector<1x1x32xf32>
    %78 = vector.shape_cast %77 : vector<1x1x32xf32> to vector<1x32xf32>
    %79 = vector.shape_cast %76 : vector<1x32xf32> to vector<1x1x32xf32>
    tpu.vector_store %arg9[%c0_42, %c0_43, %c224], %79 {strides = array<i32>} : memref<1x1x768xf32, #tpu.memory_space<vmem>>, vector<1x1x32xf32>,
    %80 = vector.extract_strided_slice %47 {offsets = [8, 0], sizes = [1, 32], strides = [1, 1]} : vector<24x32xf32> to vector<1x32xf32>
    %c0_44 = arith.constant 0 : index
    %c0_45 = arith.constant 0 : index
    %c256 = arith.constant 256 : index
    %81 = vector.load %arg9[%c0_44, %c0_45, %c256] : memref<1x1x768xf32, #tpu.memory_space<vmem>>, vector<1x1x32xf32>
    %82 = vector.shape_cast %81 : vector<1x1x32xf32> to vector<1x32xf32>
    %83 = vector.shape_cast %80 : vector<1x32xf32> to vector<1x1x32xf32>
    tpu.vector_store %arg9[%c0_44, %c0_45, %c256], %83 {strides = array<i32>} : memref<1x1x768xf32, #tpu.memory_space<vmem>>, vector<1x1x32xf32>,
    %84 = vector.extract_strided_slice %47 {offsets = [9, 0], sizes = [1, 32], strides = [1, 1]} : vector<24x32xf32> to vector<1x32xf32>
    %c0_46 = arith.constant 0 : index
    %c0_47 = arith.constant 0 : index
    %c288 = arith.constant 288 : index
    %85 = vector.load %arg9[%c0_46, %c0_47, %c288] : memref<1x1x768xf32, #tpu.memory_space<vmem>>, vector<1x1x32xf32>
    %86 = vector.shape_cast %85 : vector<1x1x32xf32> to vector<1x32xf32>
    %87 = vector.shape_cast %84 : vector<1x32xf32> to vector<1x1x32xf32>
    tpu.vector_store %arg9[%c0_46, %c0_47, %c288], %87 {strides = array<i32>} : memref<1x1x768xf32, #tpu.memory_space<vmem>>, vector<1x1x32xf32>,
    %88 = vector.extract_strided_slice %47 {offsets = [10, 0], sizes = [1, 32], strides = [1, 1]} : vector<24x32xf32> to vector<1x32xf32>
    %c0_48 = arith.constant 0 : index
    %c0_49 = arith.constant 0 : index
    %c320 = arith.constant 320 : index
    %89 = vector.load %arg9[%c0_48, %c0_49, %c320] : memref<1x1x768xf32, #tpu.memory_space<vmem>>, vector<1x1x32xf32>
    %90 = vector.shape_cast %89 : vector<1x1x32xf32> to vector<1x32xf32>
    %91 = vector.shape_cast %88 : vector<1x32xf32> to vector<1x1x32xf32>
    tpu.vector_store %arg9[%c0_48, %c0_49, %c320], %91 {strides = array<i32>} : memref<1x1x768xf32, #tpu.memory_space<vmem>>, vector<1x1x32xf32>,
    %92 = vector.extract_strided_slice %47 {offsets = [11, 0], sizes = [1, 32], strides = [1, 1]} : vector<24x32xf32> to vector<1x32xf32>
    %c0_50 = arith.constant 0 : index
    %c0_51 = arith.constant 0 : index
    %c352 = arith.constant 352 : index
    %93 = vector.load %arg9[%c0_50, %c0_51, %c352] : memref<1x1x768xf32, #tpu.memory_space<vmem>>, vector<1x1x32xf32>
    %94 = vector.shape_cast %93 : vector<1x1x32xf32> to vector<1x32xf32>
    %95 = vector.shape_cast %92 : vector<1x32xf32> to vector<1x1x32xf32>
    tpu.vector_store %arg9[%c0_50, %c0_51, %c352], %95 {strides = array<i32>} : memref<1x1x768xf32, #tpu.memory_space<vmem>>, vector<1x1x32xf32>,
    %96 = vector.extract_strided_slice %47 {offsets = [12, 0], sizes = [1, 32], strides = [1, 1]} : vector<24x32xf32> to vector<1x32xf32>
    %c0_52 = arith.constant 0 : index
    %c0_53 = arith.constant 0 : index
    %c384 = arith.constant 384 : index
    %97 = vector.load %arg9[%c0_52, %c0_53, %c384] : memref<1x1x768xf32, #tpu.memory_space<vmem>>, vector<1x1x32xf32>
    %98 = vector.shape_cast %97 : vector<1x1x32xf32> to vector<1x32xf32>
    %99 = vector.shape_cast %96 : vector<1x32xf32> to vector<1x1x32xf32>
    tpu.vector_store %arg9[%c0_52, %c0_53, %c384], %99 {strides = array<i32>} : memref<1x1x768xf32, #tpu.memory_space<vmem>>, vector<1x1x32xf32>,
    %100 = vector.extract_strided_slice %47 {offsets = [13, 0], sizes = [1, 32], strides = [1, 1]} : vector<24x32xf32> to vector<1x32xf32>
    %c0_54 = arith.constant 0 : index
    %c0_55 = arith.constant 0 : index
    %c416 = arith.constant 416 : index
    %101 = vector.load %arg9[%c0_54, %c0_55, %c416] : memref<1x1x768xf32, #tpu.memory_space<vmem>>, vector<1x1x32xf32>
    %102 = vector.shape_cast %101 : vector<1x1x32xf32> to vector<1x32xf32>
    %103 = vector.shape_cast %100 : vector<1x32xf32> to vector<1x1x32xf32>
    tpu.vector_store %arg9[%c0_54, %c0_55, %c416], %103 {strides = array<i32>} : memref<1x1x768xf32, #tpu.memory_space<vmem>>, vector<1x1x32xf32>,
    %104 = vector.extract_strided_slice %47 {offsets = [14, 0], sizes = [1, 32], strides = [1, 1]} : vector<24x32xf32> to vector<1x32xf32>
    %c0_56 = arith.constant 0 : index
    %c0_57 = arith.constant 0 : index
    %c448 = arith.constant 448 : index
    %105 = vector.load %arg9[%c0_56, %c0_57, %c448] : memref<1x1x768xf32, #tpu.memory_space<vmem>>, vector<1x1x32xf32>
    %106 = vector.shape_cast %105 : vector<1x1x32xf32> to vector<1x32xf32>
    %107 = vector.shape_cast %104 : vector<1x32xf32> to vector<1x1x32xf32>
    tpu.vector_store %arg9[%c0_56, %c0_57, %c448], %107 {strides = array<i32>} : memref<1x1x768xf32, #tpu.memory_space<vmem>>, vector<1x1x32xf32>,
    %108 = vector.extract_strided_slice %47 {offsets = [15, 0], sizes = [1, 32], strides = [1, 1]} : vector<24x32xf32> to vector<1x32xf32>
    %c0_58 = arith.constant 0 : index
    %c0_59 = arith.constant 0 : index
    %c480 = arith.constant 480 : index
    %109 = vector.load %arg9[%c0_58, %c0_59, %c480] : memref<1x1x768xf32, #tpu.memory_space<vmem>>, vector<1x1x32xf32>
    %110 = vector.shape_cast %109 : vector<1x1x32xf32> to vector<1x32xf32>
    %111 = vector.shape_cast %108 : vector<1x32xf32> to vector<1x1x32xf32>
    tpu.vector_store %arg9[%c0_58, %c0_59, %c480], %111 {strides = array<i32>} : memref<1x1x768xf32, #tpu.memory_space<vmem>>, vector<1x1x32xf32>,
    %112 = vector.extract_strided_slice %47 {offsets = [16, 0], sizes = [1, 32], strides = [1, 1]} : vector<24x32xf32> to vector<1x32xf32>
    %c0_60 = arith.constant 0 : index
    %c0_61 = arith.constant 0 : index
    %c512 = arith.constant 512 : index
    %113 = vector.load %arg9[%c0_60, %c0_61, %c512] : memref<1x1x768xf32, #tpu.memory_space<vmem>>, vector<1x1x32xf32>
    %114 = vector.shape_cast %113 : vector<1x1x32xf32> to vector<1x32xf32>
    %115 = vector.shape_cast %112 : vector<1x32xf32> to vector<1x1x32xf32>
    tpu.vector_store %arg9[%c0_60, %c0_61, %c512], %115 {strides = array<i32>} : memref<1x1x768xf32, #tpu.memory_space<vmem>>, vector<1x1x32xf32>,
    %116 = vector.extract_strided_slice %47 {offsets = [17, 0], sizes = [1, 32], strides = [1, 1]} : vector<24x32xf32> to vector<1x32xf32>
    %c0_62 = arith.constant 0 : index
    %c0_63 = arith.constant 0 : index
    %c544 = arith.constant 544 : index
    %117 = vector.load %arg9[%c0_62, %c0_63, %c544] : memref<1x1x768xf32, #tpu.memory_space<vmem>>, vector<1x1x32xf32>
    %118 = vector.shape_cast %117 : vector<1x1x32xf32> to vector<1x32xf32>
    %119 = vector.shape_cast %116 : vector<1x32xf32> to vector<1x1x32xf32>
    tpu.vector_store %arg9[%c0_62, %c0_63, %c544], %119 {strides = array<i32>} : memref<1x1x768xf32, #tpu.memory_space<vmem>>, vector<1x1x32xf32>,
    %120 = vector.extract_strided_slice %47 {offsets = [18, 0], sizes = [1, 32], strides = [1, 1]} : vector<24x32xf32> to vector<1x32xf32>
    %c0_64 = arith.constant 0 : index
    %c0_65 = arith.constant 0 : index
    %c576 = arith.constant 576 : index
    %121 = vector.load %arg9[%c0_64, %c0_65, %c576] : memref<1x1x768xf32, #tpu.memory_space<vmem>>, vector<1x1x32xf32>
    %122 = vector.shape_cast %121 : vector<1x1x32xf32> to vector<1x32xf32>
    %123 = vector.shape_cast %120 : vector<1x32xf32> to vector<1x1x32xf32>
    tpu.vector_store %arg9[%c0_64, %c0_65, %c576], %123 {strides = array<i32>} : memref<1x1x768xf32, #tpu.memory_space<vmem>>, vector<1x1x32xf32>,
    %124 = vector.extract_strided_slice %47 {offsets = [19, 0], sizes = [1, 32], strides = [1, 1]} : vector<24x32xf32> to vector<1x32xf32>
    %c0_66 = arith.constant 0 : index
    %c0_67 = arith.constant 0 : index
    %c608 = arith.constant 608 : index
    %125 = vector.load %arg9[%c0_66, %c0_67, %c608] : memref<1x1x768xf32, #tpu.memory_space<vmem>>, vector<1x1x32xf32>
    %126 = vector.shape_cast %125 : vector<1x1x32xf32> to vector<1x32xf32>
    %127 = vector.shape_cast %124 : vector<1x32xf32> to vector<1x1x32xf32>
    tpu.vector_store %arg9[%c0_66, %c0_67, %c608], %127 {strides = array<i32>} : memref<1x1x768xf32, #tpu.memory_space<vmem>>, vector<1x1x32xf32>,
    %128 = vector.extract_strided_slice %47 {offsets = [20, 0], sizes = [1, 32], strides = [1, 1]} : vector<24x32xf32> to vector<1x32xf32>
    %c0_68 = arith.constant 0 : index
    %c0_69 = arith.constant 0 : index
    %c640 = arith.constant 640 : index
    %129 = vector.load %arg9[%c0_68, %c0_69, %c640] : memref<1x1x768xf32, #tpu.memory_space<vmem>>, vector<1x1x32xf32>
    %130 = vector.shape_cast %129 : vector<1x1x32xf32> to vector<1x32xf32>
    %131 = vector.shape_cast %128 : vector<1x32xf32> to vector<1x1x32xf32>
    tpu.vector_store %arg9[%c0_68, %c0_69, %c640], %131 {strides = array<i32>} : memref<1x1x768xf32, #tpu.memory_space<vmem>>, vector<1x1x32xf32>,
    %132 = vector.extract_strided_slice %47 {offsets = [21, 0], sizes = [1, 32], strides = [1, 1]} : vector<24x32xf32> to vector<1x32xf32>
    %c0_70 = arith.constant 0 : index
    %c0_71 = arith.constant 0 : index
    %c672 = arith.constant 672 : index
    %133 = vector.load %arg9[%c0_70, %c0_71, %c672] : memref<1x1x768xf32, #tpu.memory_space<vmem>>, vector<1x1x32xf32>
    %134 = vector.shape_cast %133 : vector<1x1x32xf32> to vector<1x32xf32>
    %135 = vector.shape_cast %132 : vector<1x32xf32> to vector<1x1x32xf32>
    tpu.vector_store %arg9[%c0_70, %c0_71, %c672], %135 {strides = array<i32>} : memref<1x1x768xf32, #tpu.memory_space<vmem>>, vector<1x1x32xf32>,
    %136 = vector.extract_strided_slice %47 {offsets = [22, 0], sizes = [1, 32], strides = [1, 1]} : vector<24x32xf32> to vector<1x32xf32>
    %c0_72 = arith.constant 0 : index
    %c0_73 = arith.constant 0 : index
    %c704 = arith.constant 704 : index
    %137 = vector.load %arg9[%c0_72, %c0_73, %c704] : memref<1x1x768xf32, #tpu.memory_space<vmem>>, vector<1x1x32xf32>
    %138 = vector.shape_cast %137 : vector<1x1x32xf32> to vector<1x32xf32>
    %139 = vector.shape_cast %136 : vector<1x32xf32> to vector<1x1x32xf32>
    tpu.vector_store %arg9[%c0_72, %c0_73, %c704], %139 {strides = array<i32>} : memref<1x1x768xf32, #tpu.memory_space<vmem>>, vector<1x1x32xf32>,
    %140 = vector.extract_strided_slice %47 {offsets = [23, 0], sizes = [1, 32], strides = [1, 1]} : vector<24x32xf32> to vector<1x32xf32>
    %c0_74 = arith.constant 0 : index
    %c0_75 = arith.constant 0 : index
    %c736 = arith.constant 736 : index
    %141 = vector.load %arg9[%c0_74, %c0_75, %c736] : memref<1x1x768xf32, #tpu.memory_space<vmem>>, vector<1x1x32xf32>
    %142 = vector.shape_cast %141 : vector<1x1x32xf32> to vector<1x32xf32>
    %143 = vector.shape_cast %140 : vector<1x32xf32> to vector<1x1x32xf32>
    tpu.vector_store %arg9[%c0_74, %c0_75, %c736], %143 {strides = array<i32>} : memref<1x1x768xf32, #tpu.memory_space<vmem>>, vector<1x1x32xf32>,
    return
  }
  func.func @transform_0(%arg0: i32) -> (i32, i32, i32) {
    %c0_i32 = arith.constant 0 : i32
    %c0_i32_0 = arith.constant 0 : i32
    %c0_i32_1 = arith.constant 0 : i32
    return %arg0, %c0_i32, %c0_i32_0 : i32, i32, i32
  }
  func.func @transform_1(%arg0: i32) -> (i32, i32, i32) {
    %c0_i32 = arith.constant 0 : i32
    %c0_i32_0 = arith.constant 0 : i32
    %c0_i32_1 = arith.constant 0 : i32
    return %arg0, %c0_i32, %c0_i32_0 : i32, i32, i32
  }
  func.func @transform_2(%arg0: i32) -> (i32, i32) {
    %c0_i32 = arith.constant 0 : i32
    %c0_i32_0 = arith.constant 0 : i32
    return %arg0, %c0_i32 : i32, i32
  }
  func.func @transform_3(%arg0: i32) -> (i32, i32) {
    %c0_i32 = arith.constant 0 : i32
    %c0_i32_0 = arith.constant 0 : i32
    %c0_i32_1 = arith.constant 0 : i32
    return %c0_i32, %c0_i32_0 : i32, i32
  }
  func.func @transform_4(%arg0: i32) -> (i32, i32) {
    %c0_i32 = arith.constant 0 : i32
    %c0_i32_0 = arith.constant 0 : i32
    %c0_i32_1 = arith.constant 0 : i32
    return %c0_i32, %c0_i32_0 : i32, i32
  }
  func.func @transform_5(%arg0: i32) -> (i32, i32) {
    %c0_i32 = arith.constant 0 : i32
    %c0_i32_0 = arith.constant 0 : i32
    %c0_i32_1 = arith.constant 0 : i32
    return %c0_i32, %c0_i32_0 : i32, i32
  }
  func.func @transform_6(%arg0: i32) -> (i32, i32) {
    %c0_i32 = arith.constant 0 : i32
    %c0_i32_0 = arith.constant 0 : i32
    %c0_i32_1 = arith.constant 0 : i32
    return %c0_i32, %c0_i32_0 : i32, i32
  }
  func.func @transform_7(%arg0: i32) -> (i32, i32) {
    %c0_i32 = arith.constant 0 : i32
    %c0_i32_0 = arith.constant 0 : i32
    %c0_i32_1 = arith.constant 0 : i32
    return %c0_i32, %c0_i32_0 : i32, i32
  }
  func.func @transform_8(%arg0: i32) -> (i32, i32, i32) {
    %c0_i32 = arith.constant 0 : i32
    %c0_i32_0 = arith.constant 0 : i32
    %c0_i32_1 = arith.constant 0 : i32
    return %arg0, %c0_i32, %c0_i32_0 : i32, i32, i32
  }
}

</mosaic_0001>

<bundles_post_ra>
// kernel: tpu_custom_call.1
= control target key start
LH: loop header
LB: loop body
LE: loop exit
PB: predicated region body
PF: predicated region fallthrough
CT: control target
= control target key end

     0   :  { %14 = vsyncpa [#allocation4], 0  ;;  %s3585_s0 = inlined_call_operand.hbm [shape: f32[24,8,32], index: 0, kind: input, shape index: {}]   ;;  %s3586_s1 = inlined_call_operand.hbm [shape: f32[24,8,32], index: 1, kind: input, shape index: {}]   ;;  %s3587_s2 = inlined_call_operand.vmem [shape: f32[24,8], index: 2, kind: input, shape index: {}]   ;;  %s3588_s3 = inlined_call_operand.vmem [shape: f32[32,32], index: 3, kind: input, shape index: {}]   ;;  %s3589_s4 = inlined_call_operand.vmem [shape: f32[1,32], index: 4, kind: input, shape index: {}]   ;;  %s3590_s5 = inlined_call_operand.vmem [shape: f32[32,4], index: 5, kind: input, shape index: {}]   ;;  %s3591_s6 = inlined_call_operand.vmem [shape: f32[1,4], index: 6, kind: input, shape index: {}]   ;;  %s3592_s7 = inlined_call_operand.<no memory space> [shape: f32[1,1], index: 7, kind: input, shape index: {}]   ;;  %s3593_s8 = inlined_call_operand.hbm [shape: f32[1,1,768], index: 8, kind: output, shape index: {}]  }
   0x1   :  { %15 = vsyncpa [#allocation7], 0 }
   0x2   :  { %16 = vsyncpa [#allocation5], 0  ;;  %s2543_s27 = smov [#allocation3]   ;;  %s2471_s9 = scalar_lea.hbm %s3585_s0, 3072 }
   0x3   :  { %s22_s28 = sshll.u32 %s2543_s27, 4  ;;  %p2472_p0 = scmp.ne.s32.totalorder %s3585_s0, %s2471_s9  ;;  %s23_s28 = int_to_ptr.vmem [resolvable:$true] %s22_s28 }
   0x4   :  { %p2475_p1 = scmp.lt.u32.totalorder %s2471_s9, %s3585_s0 }
   0x6   :  { %p2477_p2 = pnand %p2475_p1, %p2472_p0 }
   0x8   :  { %2480 = shalt.err (!%p2477_p2)
}
   0x9   :  { %s2481_s14 = scalar_lea.vmem %s23_s28, 3072  ;;  %p2486_p4 = scmp.lt.s32.totalorder %s23_s28, %s23_s28 }
   0xa   :  { %p2482_p3 = scmp.ne.s32.totalorder %s23_s28, %s2481_s14  ;;  %p2487_p5 = scmp.lt.s32.totalorder %s2481_s14, %s2481_s14 }
   0xc   :  { %p2488_p6 = por %p2487_p5, %p2486_p4 }
   0xe   :  { %p2489_p7 = pnand %p2488_p6, %p2482_p3 }
  0x10   :  { %2492 = shalt.err (!%p2489_p7)
}
  0x11   :  { %s2544_s15 = smov 128   ;;  %s2545_s16 = smov 8  }
  0x12   :  { %28 = dma.hbm_to_vmem [thread:$0]  %s3585_s0, 3072, %s23_s28, [#allocation4], %s2544_s15, %s2544_s15, %s2545_s16  }
  0x13   :  { %s2546_s19 = smov [#allocation6]   ;;  %s2493_s23 = scalar_lea.hbm %s3586_s1, 3072 }
  0x14   :  { %s34_s20 = sshll.u32 %s2546_s19, 4  ;;  %p2494_p8 = scmp.ne.s32.totalorder %s3586_s1, %s2493_s23  ;;  %s35_s20 = int_to_ptr.vmem [resolvable:$true] %s34_s20 }
  0x15   :  { %p2497_p9 = scmp.lt.u32.totalorder %s2493_s23, %s3586_s1 }
  0x17   :  { %p2499_p10 = pnand %p2497_p9, %p2494_p8 }
  0x19   :  { %2502 = shalt.err (!%p2499_p10)
}
  0x1a   :  { %s2503_s29 = scalar_lea.vmem %s35_s20, 3072  ;;  %p2508_p12 = scmp.lt.s32.totalorder %s35_s20, %s35_s20 }
  0x1b   :  { %p2504_p11 = scmp.ne.s32.totalorder %s35_s20, %s2503_s29  ;;  %p2509_p13 = scmp.lt.s32.totalorder %s2503_s29, %s2503_s29 }
  0x1d   :  { %p2510_p0 = por %p2509_p13, %p2508_p12 }
  0x1f   :  { %p2511_p1 = pnand %p2510_p0, %p2504_p11 }
  0x21   :  { %2514 = shalt.err (!%p2511_p1)
}
  0x22   :  { %40 = dma.hbm_to_vmem [thread:$0]  %s3586_s1, 3072, %s35_s20, [#allocation7], %s2544_s15, %s2544_s15, %s2545_s16  }
  0x23   :  { %2537 = dma.done.wait [#allocation4], 3072  }
  0x24   :  { %2538 = vsyncadd [#allocation4], 4294964224 }
  0x25   :  { %2539 = dma.done.wait [#allocation7], 3072  }
  0x26   :  { %2540 = vsyncadd [#allocation7], 4294964224  ;;  %vm94_vm0 = vcmask 261120   ;;  %v83_v0 = vld [vmem:[%s3588_s3] sm:$0xff]  ;;  %v84_v1 = vld [vmem:[%s3588_s3 + $0x8] sm:$0xff]  ;;  %v3594_v36 = vlaneseq  ;;  %s2549_s28 = smov 96  }
  0x27   :  { %v85_v2 = vld [vmem:[%s3588_s3 + $0x10] sm:$0xff]  ;;  %v2350_v3 = vpack.c.bf16 %v84_v1, %v83_v0  ;;  %v86_v4 = vld [vmem:[%s3588_s3 + $0x18] sm:$0xff]  ;;  %v59_v5 = vld [vmem:[#allocation3] sm:$0xff]  ;;  %s2550_s30 = smov 64   ;;  %s2551_s9 = smov [#allocation8]  }
  0x28   :  { %v2354_v6 = vpack.c.bf16 %v86_v4, %v85_v2  ;;  %2270 = vmatprep.mubr.msk.f32.mxu0 %vm94_vm0, %v59_v5  ;;  %v60_v7 = vld [vmem:[#allocation3 + $0x8] sm:$0xff]  ;;  %v61_v8 = vld [vmem:[#allocation3 + $0x10] sm:$0xff]  ;;  %v62_v9 = vld [vmem:[#allocation3 + $0x18] sm:$0xff]  ;;  %v2670_v37 = vshrl.u32 %v3594_v36, 7  ;;  %s2122_s10 = sshll.u32 %s2551_s9, 4  ;;  %s2123_s10 = int_to_ptr.vmem [resolvable:$true] %s2122_s10 }
  0x29   :  { %2351 = vmatprep.subr.bf16.mxu0 %v2350_v3  ;;  %v63_v10 = vld [vmem:[#allocation3 + $0x20] sm:$0xff]  ;;  %v64_v11 = vld [vmem:[#allocation3 + $0x28] sm:$0xff]  ;;  %v65_v12 = vld [vmem:[#allocation3 + $0x30] sm:$0xff]  ;;  %s2515_s11 = scalar_lea.vmem %s2123_s10, 96  ;;  %p2520_p3 = scmp.lt.s32.totalorder %s2123_s10, %s2123_s10 }
  0x2a   :  { %2353 = vmatpush3.bf16.msra.mxu0 %v2350_v3  ;;  %v66_v13 = vld [vmem:[#allocation3 + $0x38] sm:$0xff]  ;;  %v67_v14 = vld [vmem:[#allocation3 + $0x40] sm:$0xff]  ;;  %v68_v15 = vld [vmem:[#allocation3 + $0x48] sm:$0xff]  ;;  %3601 = vst [vmem:[#allocation12_spill] sm:$0xff] %v2670_v37  ;;  %v706_v40 = vsub.s32 1, %v2670_v37  ;;  %v734_v41 = vsub.s32 5, %v2670_v37  ;;  %p2516_p2 = scmp.ne.s32.totalorder %s2123_s10, %s2515_s11  ;;  %p2521_p4 = scmp.lt.s32.totalorder %s2515_s11, %s2515_s11 }
  0x2b   :  { %2355 = vmatprep.subr.bf16.mxu0 %v2354_v6  ;;  %v69_v16 = vld [vmem:[#allocation3 + $0x50] sm:$0xff]  ;;  %v70_v17 = vld [vmem:[#allocation3 + $0x58] sm:$0xff]  ;;  %v71_v18 = vld [vmem:[#allocation3 + $0x60] sm:$0xff]  ;;  %v713_v48 = vsub.s32 2, %v2670_v37  ;;  %v741_v50 = vsub.s32 6, %v2670_v37  ;;  %v720_v56 = vsub.s32 3, %v2670_v37 }
  0x2c   :  { %v72_v19 = vld [vmem:[#allocation3 + $0x68] sm:$0xff]  ;;  %v73_v20 = vld [vmem:[#allocation3 + $0x70] sm:$0xff]  ;;  %v74_v21 = vld [vmem:[#allocation3 + $0x78] sm:$0xff]  ;;  %v748_v58 = vsub.s32 7, %v2670_v37  ;;  %v699_v0 = vsub.s32 0, %v2670_v37  ;;  %v727_v2 = vsub.s32 4, %v2670_v37  ;;  %p2522_p5 = por %p2521_p4, %p2520_p3 }
  0x2d   :  { %v75_v22 = vld [vmem:[#allocation3 + $0x80] sm:$0xff]  ;;  %v76_v23 = vld [vmem:[#allocation3 + $0x88] sm:$0xff]  ;;  %v77_v24 = vld [vmem:[#allocation3 + $0x90] sm:$0xff] }
  0x2e   :  { %2357 = vmatpush3.bf16.msra.mxu0 %v2354_v6  ;;  %v78_v25 = vld [vmem:[#allocation3 + $0x98] sm:$0xff]  ;;  %v79_v26 = vld [vmem:[#allocation3 + $0xa0] sm:$0xff]  ;;  %v80_v27 = vld [vmem:[#allocation3 + $0xa8] sm:$0xff]  ;;  %p2523_p6 = pnand %p2522_p5, %p2516_p2 }
  0x2f   :  { %v81_v28 = vld [vmem:[#allocation3 + $0xb0] sm:$0xff]  ;;  %v82_v29 = vld [vmem:[#allocation3 + $0xb8] sm:$0xff]  ;;  %v426_v30 = vld [vmem:[%s3590_s5] sm:$0xff] }
  0x30   :  { %v427_v31 = vld [vmem:[%s3590_s5 + $0x8] sm:$0xff]  ;;  %v428_v33 = vld [vmem:[%s3590_s5 + $0x10] sm:$0xff]  ;;  %v429_v34 = vld [vmem:[%s3590_s5 + $0x18] sm:$0xff] }
  0x31   :  { %2271 = vmatmul.mubr.msk.f32.vlgmr.msra.gmra.mrb[0].mxu0 %vm94_vm0, %v60_v7  ;;  %v2358_v32 = vpack.c.bf16 %v427_v31, %v426_v30  ;;  %v2362_v35 = vpack.c.bf16 %v429_v34, %v428_v33  ;;  %v694_v38 = vld [vmem:[%s3587_s2] sm:$0xff]  ;;  %v695_v39 = vld [vmem:[%s3587_s2 + $0x8] sm:$0xff]  ;;  %v696_v46 = vld [vmem:[%s3587_s2 + $0x10] sm:$0xff] }
  0x32   :  { %2273 = vmatprep.mubr.msk.f32.mxu0 %vm94_vm0, %v61_v8  ;;  %v707_v42 = vrot.slane %v694_v38, %v706_v40  ;;  %v763_v43 = vrot.slane %v695_v39, %v706_v40  ;;  %v735_v44 = vrot.slane %v694_v38, %v734_v41  ;;  %v791_v45 = vrot.slane %v695_v39, %v734_v41 }
  0x33   :  { %2359 = vmatprep.subr.bf16.mxu1 %v2358_v32  ;;  %v819_v47 = vrot.slane %v696_v46, %v706_v40  ;;  %v847_v49 = vrot.slane %v696_v46, %v734_v41  ;;  %v714_v51 = vrot.slane %v694_v38, %v713_v48  ;;  %v742_v52 = vrot.slane %v694_v38, %v741_v50 }
  0x34   :  { %2361 = vmatpush3.bf16.msra.mxu1 %v2358_v32  ;;  %709 = vbcast.lane.b32.xlu0 %v707_v42, 256  ;;  %v770_v53 = vrot.slane %v695_v39, %v713_v48  ;;  %v798_v54 = vrot.slane %v695_v39, %v741_v50  ;;  %v826_v55 = vrot.slane %v696_v46, %v713_v48 }
  0x35   :  { %2274 = vmatmul.mubr.msk.f32.gmra.mrb[2].mxu0 %vm94_vm0, %v62_v9  ;;  %2363 = vmatprep.subr.bf16.mxu1 %v2362_v35  ;;  %v854_v57 = vrot.slane %v696_v46, %v741_v50  ;;  %v721_v59 = vrot.slane %v694_v38, %v720_v56  ;;  %v749_v60 = vrot.slane %v694_v38, %v748_v58  ;;  %v2692_v9 = vld [vmem:[%s3589_s4] ss:$0 sm:$0xff] }
  0x36   :  { %2276 = vmatprep.mubr.msk.f32.mxu0 %vm94_vm0, %v63_v10  ;;  %765 = vbcast.lane.b32.xlu1 %v763_v43, 256  ;;  %v777_v61 = vrot.slane %v695_v39, %v720_v56  ;;  %v805_v62 = vrot.slane %v695_v39, %v748_v58  ;;  %v833_v63 = vrot.slane %v696_v46, %v720_v56 }
  0x37   :  { %v861_v1 = vrot.slane %v696_v46, %v748_v58  ;;  %v700_v3 = vrot.slane %v694_v38, %v699_v0  ;;  %v728_v4 = vrot.slane %v694_v38, %v727_v2  ;;  %v756_v5 = vrot.slane %v695_v39, %v699_v0 }
  0x38   :  { %2365 = vmatpush3.bf16.msra.mxu1 %v2362_v35  ;;  %737 = vbcast.lane.b32.xlu0 %v735_v44, 256  ;;  %v784_v6 = vrot.slane %v695_v39, %v727_v2  ;;  %v812_v7 = vrot.slane %v696_v46, %v699_v0  ;;  %v840_v8 = vrot.slane %v696_v46, %v727_v2 }
  0x39   :  { %2277 = vmatmul.mubr.msk.f32.gmra.mrb[4].mxu0 %vm94_vm0, %v64_v11  ;;  %v2697_v11 = vstv %s3592_s7 }
  0x3a   :  { %2279 = vmatprep.mubr.msk.f32.mxu0 %vm94_vm0, %v65_v12  ;;  %793 = vbcast.lane.b32.xlu1 %v791_v45, 256 }
  0x3c   :  { %821 = vbcast.lane.b32.xlu0 %v819_v47, 256 }
  0x3d   :  { %2280 = vmatmul.mubr.msk.f32.gmra.mrb[6].mxu0 %vm94_vm0, %v66_v13 }
  0x3e   :  { %2282 = vmatprep.mubr.msk.f32.mxu0 %vm94_vm0, %v67_v14  ;;  %849 = vbcast.lane.b32.xlu1 %v847_v49, 256 }
  0x40   :  { %716 = vbcast.lane.b32.xlu0 %v714_v51, 256 }
  0x41   :  { %2283 = vmatmul.mubr.msk.f32.gmra.mrb[8].mxu0 %vm94_vm0, %v68_v15 }
  0x42   :  { %2285 = vmatprep.mubr.msk.f32.mxu0 %vm94_vm0, %v69_v16  ;;  %744 = vbcast.lane.b32.xlu1 %v742_v52, 256 }
  0x44   :  { %772 = vbcast.lane.b32.xlu0 %v770_v53, 256 }
  0x45   :  { %2286 = vmatmul.mubr.msk.f32.gmra.mrb[10].mxu0 %vm94_vm0, %v70_v17 }
  0x46   :  { %2288 = vmatprep.mubr.msk.f32.mxu0 %vm94_vm0, %v71_v18  ;;  %800 = vbcast.lane.b32.xlu1 %v798_v54, 256 }
  0x48   :  { %828 = vbcast.lane.b32.xlu0 %v826_v55, 256 }
  0x49   :  { %2289 = vmatmul.mubr.msk.f32.gmra.mrb[12].mxu0 %vm94_vm0, %v72_v19 }
  0x4a   :  { %2291 = vmatprep.mubr.msk.f32.mxu0 %vm94_vm0, %v73_v20  ;;  %856 = vbcast.lane.b32.xlu1 %v854_v57, 256 }
  0x4c   :  { %723 = vbcast.lane.b32.xlu0 %v721_v59, 256 }
  0x4d   :  { %2292 = vmatmul.mubr.msk.f32.gmra.mrb[14].mxu0 %vm94_vm0, %v74_v21 }
  0x4e   :  { %2294 = vmatprep.mubr.msk.f32.mxu0 %vm94_vm0, %v75_v22  ;;  %751 = vbcast.lane.b32.xlu1 %v749_v60, 256 }
  0x50   :  { %779 = vbcast.lane.b32.xlu0 %v777_v61, 256 }
  0x51   :  { %2295 = vmatmul.mubr.msk.f32.gmra.mrb[16].mxu0 %vm94_vm0, %v76_v23 }
  0x52   :  { %2297 = vmatprep.mubr.msk.f32.mxu0 %vm94_vm0, %v77_v24  ;;  %807 = vbcast.lane.b32.xlu1 %v805_v62, 256 }
  0x54   :  { %835 = vbcast.lane.b32.xlu0 %v833_v63, 256 }
  0x55   :  { %2298 = vmatmul.mubr.msk.f32.gmra.mrb[18].mxu0 %vm94_vm0, %v78_v25 }
  0x56   :  { %2300 = vmatprep.mubr.msk.f32.mxu0 %vm94_vm0, %v79_v26  ;;  %863 = vbcast.lane.b32.xlu1 %v861_v1, 256 }
  0x58   :  { %702 = vbcast.lane.b32.xlu0 %v700_v3, 256 }
  0x59   :  { %2301 = vmatmul.mubr.msk.f32.gmra.mrb[20].mxu0 %vm94_vm0, %v80_v27 }
  0x5a   :  { %2303 = vmatprep.mubr.msk.f32.mxu0 %vm94_vm0, %v81_v28  ;;  %730 = vbcast.lane.b32.xlu1 %v728_v4, 256 }
  0x5c   :  { %758 = vbcast.lane.b32.xlu0 %v756_v5, 256 }
  0x5d   :  { %2304 = vmatmul.mubr.msk.f32.gmra.mrb[22].mxu0 %vm94_vm0, %v82_v29 }
  0x5e   :  { %786 = vbcast.lane.b32.xlu1 %v784_v6, 256 }
  0x60   :  { %814 = vbcast.lane.b32.xlu0 %v812_v7, 256 }
  0x62   :  { %842 = vbcast.lane.b32.xlu1 %v840_v8, 256 }
 0x104   :  { %v2272_v10 = vpop.f32.mrb[0].mxu0 }
 0x105   :  { %v239_v12 = vadd.f32 %v2272_v10, %v2692_v9  ;;  %v233_v13 = vpop.f32.mrb[1].mxu0 }
 0x106   :  { %v234_v14 = vadd.f32 %v2692_v9, %v233_v13 }
 0x107   :  { %v379_v15 = vmul.f32 %v2697_v11, %v239_v12  ;;  %vm354_vm1 = vcmp.gt.f32.partialorder %v239_v12, 0.0 }
 0x108   :  { %v2275_v16 = vpop.f32.mrb[2].mxu0  ;;  %vm353_vm2 = vcmp.gt.f32.partialorder %v234_v14, 0.0  ;;  %v378_v17 = vmul.f32 %v2697_v11, %v234_v14 }
 0x109   :  { %v249_v18 = vadd.f32 %v2275_v16, %v2692_v9  ;;  %v243_v19 = vpop.f32.mrb[3].mxu0  ;;  %v403_v23 = vsel %vm354_vm1, %v239_v12, %v379_v15 }
 0x10a   :  { %v244_v20 = vadd.f32 %v2692_v9, %v243_v19  ;;  %v402_v21 = vsel %vm353_vm2, %v234_v14, %v378_v17 }
 0x10b   :  { %v381_v22 = vmul.f32 %v2697_v11, %v249_v18  ;;  %2314 = vmatprep.mubr.msk.f32.mxu1 %vm94_vm0, %v402_v21  ;;  %vm356_vm3 = vcmp.gt.f32.partialorder %v249_v18, 0.0 }
 0x10c   :  { %vm355_vm4 = vcmp.gt.f32.partialorder %v244_v20, 0.0  ;;  %v380_v24 = vmul.f32 %v2697_v11, %v244_v20  ;;  %v2278_v25 = vpop.f32.mrb[4].mxu0  ;;  %2315 = vmatmul.mubr.msk.f32.vlgmr.msra.gmra.mrb[0].mxu1 %vm94_vm0, %v403_v23 }
 0x10d   :  { %v259_v26 = vadd.f32 %v2278_v25, %v2692_v9  ;;  %v253_v27 = vpop.f32.mrb[5].mxu0  ;;  %v405_v31 = vsel %vm356_vm3, %v249_v18, %v381_v22 }
 0x10e   :  { %v254_v28 = vadd.f32 %v2692_v9, %v253_v27  ;;  %v404_v29 = vsel %vm355_vm4, %v244_v20, %v380_v24 }
 0x10f   :  { %v383_v30 = vmul.f32 %v2697_v11, %v259_v26  ;;  %2317 = vmatprep.mubr.msk.f32.mxu1 %vm94_vm0, %v404_v29  ;;  %vm358_vm5 = vcmp.gt.f32.partialorder %v259_v26, 0.0 }
 0x110   :  { %vm357_vm6 = vcmp.gt.f32.partialorder %v254_v28, 0.0  ;;  %v382_v32 = vmul.f32 %v2697_v11, %v254_v28  ;;  %v2281_v33 = vpop.f32.mrb[6].mxu0  ;;  %2318 = vmatmul.mubr.msk.f32.gmra.mrb[2].mxu1 %vm94_vm0, %v405_v31 }
 0x111   :  { %v269_v34 = vadd.f32 %v2281_v33, %v2692_v9  ;;  %v263_v35 = vpop.f32.mrb[7].mxu0  ;;  %v407_v41 = vsel %vm358_vm5, %v259_v26, %v383_v30 }
 0x112   :  { %v264_v38 = vadd.f32 %v2692_v9, %v263_v35  ;;  %v406_v39 = vsel %vm357_vm6, %v254_v28, %v382_v32 }
 0x113   :  { %v385_v40 = vmul.f32 %v2697_v11, %v269_v34  ;;  %2320 = vmatprep.mubr.msk.f32.mxu1 %vm94_vm0, %v406_v39  ;;  %vm360_vm7 = vcmp.gt.f32.partialorder %v269_v34, 0.0 }
 0x114   :  { %vm359_vm8 = vcmp.gt.f32.partialorder %v264_v38, 0.0  ;;  %v384_v42 = vmul.f32 %v2697_v11, %v264_v38  ;;  %v2284_v43 = vpop.f32.mrb[8].mxu0  ;;  %2321 = vmatmul.mubr.msk.f32.gmra.mrb[4].mxu1 %vm94_vm0, %v407_v41 }
 0x115   :  { %v279_v44 = vadd.f32 %v2284_v43, %v2692_v9  ;;  %v273_v45 = vpop.f32.mrb[9].mxu0  ;;  %v409_v49 = vsel %vm360_vm7, %v269_v34, %v385_v40 }
 0x116   :  { %v274_v46 = vadd.f32 %v2692_v9, %v273_v45  ;;  %v408_v47 = vsel %vm359_vm8, %v264_v38, %v384_v42 }
 0x117   :  { %v387_v48 = vmul.f32 %v2697_v11, %v279_v44  ;;  %2323 = vmatprep.mubr.msk.f32.mxu1 %vm94_vm0, %v408_v47  ;;  %vm362_vm9 = vcmp.gt.f32.partialorder %v279_v44, 0.0 }
 0x118   :  { %vm361_vm10 = vcmp.gt.f32.partialorder %v274_v46, 0.0  ;;  %v386_v50 = vmul.f32 %v2697_v11, %v274_v46  ;;  %v2287_v51 = vpop.f32.mrb[10].mxu0  ;;  %2324 = vmatmul.mubr.msk.f32.gmra.mrb[6].mxu1 %vm94_vm0, %v409_v49  ;;  %v710_v49 = vpop.permute.xlu0 %709 }
 0x119   :  { %v289_v52 = vadd.f32 %v2287_v51, %v2692_v9  ;;  %v283_v53 = vpop.f32.mrb[11].mxu0  ;;  %v411_v57 = vsel %vm362_vm9, %v279_v44, %v387_v48 }
 0x11a   :  { %v284_v54 = vadd.f32 %v2692_v9, %v283_v53  ;;  %v410_v55 = vsel %vm361_vm10, %v274_v46, %v386_v50  ;;  %vm961_vm10 = vcmask 31744  }
 0x11b   :  { %v389_v56 = vmul.f32 %v2697_v11, %v289_v52  ;;  %2326 = vmatprep.mubr.msk.f32.mxu1 %vm94_vm0, %v410_v55  ;;  %vm364_vm11 = vcmp.gt.f32.partialorder %v289_v52, 0.0 }
 0x11c   :  { %vm363_vm12 = vcmp.gt.f32.partialorder %v284_v54, 0.0  ;;  %v388_v58 = vmul.f32 %v2697_v11, %v284_v54  ;;  %v2290_v59 = vpop.f32.mrb[12].mxu0  ;;  %2327 = vmatmul.mubr.msk.f32.gmra.mrb[8].mxu1 %vm94_vm0, %v411_v57  ;;  %v2773_v50 = vpop.permute.xlu0 %737 }
 0x11d   :  { %v299_v60 = vadd.f32 %v2290_v59, %v2692_v9  ;;  %v293_v61 = vpop.f32.mrb[13].mxu0  ;;  %v413_v1 = vsel %vm364_vm11, %v289_v52, %v389_v56 }
 0x11e   :  { %v294_v62 = vadd.f32 %v2692_v9, %v293_v61  ;;  %v412_v63 = vsel %vm363_vm12, %v284_v54, %v388_v58 }
 0x11f   :  { %v391_v0 = vmul.f32 %v2697_v11, %v299_v60  ;;  %2329 = vmatprep.mubr.msk.f32.mxu1 %vm94_vm0, %v412_v63  ;;  %vm366_vm13 = vcmp.gt.f32.partialorder %v299_v60, 0.0 }
 0x120   :  { %vm365_vm14 = vcmp.gt.f32.partialorder %v294_v62, 0.0  ;;  %v390_v2 = vmul.f32 %v2697_v11, %v294_v62  ;;  %v2293_v3 = vpop.f32.mrb[14].mxu0  ;;  %2330 = vmatmul.mubr.msk.f32.gmra.mrb[10].mxu1 %vm94_vm0, %v413_v1  ;;  %v2777_v52 = vpop.permute.xlu0 %821  ;;  %v2183_v1 = vadd.f32 -1.0, %v710_v49 }
 0x121   :  { %v309_v4 = vadd.f32 %v2293_v3, %v2692_v9  ;;  %v303_v5 = vpop.f32.mrb[15].mxu0  ;;  %v415_v10 = vsel %vm366_vm13, %v299_v60, %v391_v0  ;;  %v2187_v3 = vadd.f32 -1.0, %v2773_v50 }
 0x122   :  { %v304_v6 = vadd.f32 %v2692_v9, %v303_v5  ;;  %v414_v7 = vsel %vm365_vm14, %v294_v62, %v390_v2  ;;  %v2199_v5 = vadd.f32 -1.0, %v2777_v52 }
 0x123   :  { %v393_v8 = vmul.f32 %v2697_v11, %v309_v4  ;;  %2332 = vmatprep.mubr.msk.f32.mxu1 %vm94_vm0, %v414_v7  ;;  %vm368_vm15 = vcmp.gt.f32.partialorder %v309_v4, 0.0 }
 0x124   :  { %vm367_vm1 = vcmp.gt.f32.partialorder %v304_v6, 0.0  ;;  %v392_v12 = vmul.f32 %v2697_v11, %v304_v6  ;;  %v2296_v13 = vpop.f32.mrb[16].mxu0  ;;  %2333 = vmatmul.mubr.msk.f32.gmra.mrb[12].mxu1 %vm94_vm0, %v415_v10 }
 0x125   :  { %v319_v14 = vadd.f32 %v2296_v13, %v2692_v9  ;;  %v313_v15 = vpop.f32.mrb[17].mxu0  ;;  %v417_v19 = vsel %vm368_vm15, %v309_v4, %v393_v8 }
 0x126   :  { %v314_v16 = vadd.f32 %v2692_v9, %v313_v15  ;;  %v416_v17 = vsel %vm367_vm1, %v304_v6, %v392_v12 }
 0x127   :  { %v395_v18 = vmul.f32 %v2697_v11, %v319_v14  ;;  %2335 = vmatprep.mubr.msk.f32.mxu1 %vm94_vm0, %v416_v17  ;;  %vm370_vm2 = vcmp.gt.f32.partialorder %v319_v14, 0.0 }
 0x128   :  { %vm369_vm3 = vcmp.gt.f32.partialorder %v314_v16, 0.0  ;;  %v394_v20 = vmul.f32 %v2697_v11, %v314_v16  ;;  %v2299_v21 = vpop.f32.mrb[18].mxu0  ;;  %2336 = vmatmul.mubr.msk.f32.gmra.mrb[14].mxu1 %vm94_vm0, %v417_v19 }
 0x129   :  { %v329_v22 = vadd.f32 %v2299_v21, %v2692_v9  ;;  %v323_v23 = vpop.f32.mrb[19].mxu0  ;;  %v419_v27 = vsel %vm370_vm2, %v319_v14, %v395_v18  ;;  %v914_v14 = vmul.f32 65504.0, %v2183_v1  ;;  %v2818_v18 = vmul.f32 65504.0, %v2187_v3  ;;  %v2826_v21 = vld [vmem:[%s3591_s6] ss:$0 sm:$0xff]  ;;  %s2548_s6 = smov 32  }
 0x12a   :  { %v324_v24 = vadd.f32 %v2692_v9, %v323_v23  ;;  %v418_v25 = vsel %vm369_vm3, %v314_v16, %v394_v20 }
 0x12b   :  { %v397_v26 = vmul.f32 %v2697_v11, %v329_v22  ;;  %2338 = vmatprep.mubr.msk.f32.mxu1 %vm94_vm0, %v418_v25  ;;  %vm372_vm4 = vcmp.gt.f32.partialorder %v329_v22, 0.0 }
 0x12c   :  { %vm371_vm5 = vcmp.gt.f32.partialorder %v324_v24, 0.0  ;;  %v396_v28 = vmul.f32 %v2697_v11, %v324_v24  ;;  %v2302_v29 = vpop.f32.mrb[20].mxu0  ;;  %2339 = vmatmul.mubr.msk.f32.gmra.mrb[16].mxu1 %vm94_vm0, %v419_v27 }
 0x12d   :  { %v339_v30 = vadd.f32 %v2302_v29, %v2692_v9  ;;  %v333_v31 = vpop.f32.mrb[21].mxu0  ;;  %v421_v35 = vsel %vm372_vm4, %v329_v22, %v397_v26 }
 0x12e   :  { %v334_v32 = vadd.f32 %v2692_v9, %v333_v31  ;;  %v420_v33 = vsel %vm371_vm5, %v324_v24, %v396_v28  ;;  %v2830_v24 = vmul.f32 65504.0, %v2199_v5 }
 0x12f   :  { %v399_v34 = vmul.f32 %v2697_v11, %v339_v30  ;;  %2341 = vmatprep.mubr.msk.f32.mxu1 %vm94_vm0, %v420_v33  ;;  %vm374_vm6 = vcmp.gt.f32.partialorder %v339_v30, 0.0 }
 0x130   :  { %vm373_vm7 = vcmp.gt.f32.partialorder %v334_v32, 0.0  ;;  %v398_v38 = vmul.f32 %v2697_v11, %v334_v32  ;;  %v2305_v39 = vpop.f32.mrb[22].mxu0  ;;  %2342 = vmatmul.mubr.msk.f32.gmra.mrb[18].mxu1 %vm94_vm0, %v421_v35 }
 0x131   :  { %v349_v40 = vadd.f32 %v2305_v39, %v2692_v9  ;;  %v343_v41 = vpop.f32.mrb[23].mxu0  ;;  %v423_v45 = vsel %vm374_vm6, %v339_v30, %v399_v34 }
 0x132   :  { %v344_v42 = vadd.f32 %v2692_v9, %v343_v41  ;;  %v422_v43 = vsel %vm373_vm7, %v334_v32, %v398_v38  ;;  %v2771_v9 = vpop.permute.xlu1 %765 }
 0x133   :  { %v401_v44 = vmul.f32 %v2697_v11, %v349_v40  ;;  %2344 = vmatprep.mubr.msk.f32.mxu1 %vm94_vm0, %v422_v43  ;;  %vm376_vm8 = vcmp.gt.f32.partialorder %v349_v40, 0.0  ;;  %v2191_v2 = vadd.f32 -1.0, %v2771_v9 }
 0x134   :  { %vm375_vm9 = vcmp.gt.f32.partialorder %v344_v42, 0.0  ;;  %v400_v46 = vmul.f32 %v2697_v11, %v344_v42  ;;  %2345 = vmatmul.mubr.msk.f32.gmra.mrb[20].mxu1 %vm94_vm0, %v423_v45  ;;  %v2781_v11 = vpop.permute.xlu0 %716 }
 0x135   :  { %v425_v48 = vsel %vm376_vm8, %v349_v40, %v401_v44  ;;  %v2184_v6 = vadd.f32 -1.0, %v2781_v11  ;;  %v2814_v15 = vmul.f32 65504.0, %v2191_v2 }
 0x136   :  { %v424_v47 = vsel %vm375_vm9, %v344_v42, %v400_v46  ;;  %v2775_v51 = vpop.permute.xlu1 %793 }
 0x137   :  { %2347 = vmatprep.mubr.msk.f32.mxu1 %vm94_vm0, %v424_v47  ;;  %v2195_v4 = vadd.f32 -1.0, %v2775_v51  ;;  %v915_v25 = vmul.f32 65504.0, %v2184_v6 }
 0x138   :  { %2348 = vmatmul.mubr.msk.f32.gmra.mrb[22].mxu1 %vm94_vm0, %v425_v48  ;;  %v2785_v55 = vpop.permute.xlu0 %772 }
 0x139   :  { %v2192_v10 = vadd.f32 -1.0, %v2785_v55  ;;  %v2820_v19 = vmul.f32 65504.0, %v2195_v4 }
 0x13a   :  { %v2779_v53 = vpop.permute.xlu1 %849 }
 0x13b   :  { %3602 = vst [vmem:[#allocation13_spill] sm:$0xff] %v2779_v53  ;;  %v2203_v7 = vadd.f32 -1.0, %v2779_v53  ;;  %v2837_v29 = vmul.f32 65504.0, %v2192_v10 }
 0x13c   :  { %v2789_v57 = vpop.permute.xlu0 %828 }
 0x13d   :  { %v2200_v16 = vadd.f32 -1.0, %v2789_v57  ;;  %v2832_v26 = vmul.f32 65504.0, %v2203_v7 }
 0x13e   :  { %v2783_v54 = vpop.permute.xlu1 %744 }
 0x13f   :  { %v2188_v12 = vadd.f32 -1.0, %v2783_v54  ;;  %3605 = vst [vmem:[#allocation16_spill] sm:$0xff] %v2832_v26  ;;  %v2844_v34 = vmul.f32 65504.0, %v2200_v16 }
 0x140   :  { %v2793_v59 = vpop.permute.xlu0 %723 }
 0x141   :  { %v2185_v20 = vadd.f32 -1.0, %v2793_v59  ;;  %v2839_v30 = vmul.f32 65504.0, %v2188_v12  ;;  %3606 = vst [vmem:[#allocation17_spill] sm:$0xff] %v2844_v34 }
 0x142   :  { %v2787_v56 = vpop.permute.xlu1 %800 }
 0x143   :  { %v2196_v13 = vadd.f32 -1.0, %v2787_v56  ;;  %v916_v41 = vmul.f32 65504.0, %v2185_v20 }
 0x144   :  { %v2797_v61 = vpop.permute.xlu0 %779 }
 0x145   :  { %v2841_v31 = vmul.f32 65504.0, %v2196_v13  ;;  %v2193_v32 = vadd.f32 -1.0, %v2797_v61 }
 0x146   :  { %v2791_v58 = vpop.permute.xlu1 %856 }
 0x147   :  { %3603 = vst [vmem:[#allocation14_spill] sm:$0xff] %v2791_v58  ;;  %v2204_v17 = vadd.f32 -1.0, %v2791_v58  ;;  %v2860_v3 = vmul.f32 65504.0, %v2193_v32 }
 0x148   :  { %v2801_v63 = vpop.permute.xlu0 %835 }
 0x149   :  { %v2846_v35 = vmul.f32 65504.0, %v2204_v17  ;;  %v2201_v38 = vadd.f32 -1.0, %v2801_v63 }
 0x14a   :  { %v2795_v60 = vpop.permute.xlu1 %751 }
 0x14b   :  { %v2189_v27 = vadd.f32 -1.0, %v2795_v60  ;;  %3607 = vst [vmem:[#allocation18_spill] sm:$0xff] %v2846_v35  ;;  %v2863_v7 = vmul.f32 65504.0, %v2201_v38 }
 0x14c   :  { %v703_v8 = vpop.permute.xlu0 %702 }
 0x14d   :  { %v2182_v22 = vadd.f32 -1.0, %v703_v8  ;;  %v2854_v46 = vmul.f32 65504.0, %v2189_v27 }
 0x14e   :  { %v2799_v62 = vpop.permute.xlu1 %807 }
 0x14f   :  { %v913_v42 = vmul.f32 65504.0, %v2182_v22  ;;  %v2197_v48 = vadd.f32 -1.0, %v2799_v62 }
 0x150   :  { %v2835_v28 = vpop.permute.xlu0 %758 }
 0x151   :  { %v2190_v1 = vadd.f32 -1.0, %v2835_v28  ;;  %v2875_v27 = vmul.f32 65504.0, %v2197_v48 }
 0x152   :  { %v2803_v0 = vpop.permute.xlu1 %863 }
 0x153   :  { %3604 = vst [vmem:[#allocation15_spill] sm:$0xff] %v2803_v0  ;;  %v2205_v6 = vadd.f32 -1.0, %v2803_v0  ;;  %v2878_v32 = vmul.f32 65504.0, %v2190_v1 }
 0x154   :  { %v2858_v2 = vpop.permute.xlu0 %814 }
 0x155   :  { %v2198_v22 = vadd.f32 -1.0, %v2858_v2 }
 0x156   :  { %v2828_v23 = vpop.permute.xlu1 %730 }
 0x157   :  { %v2186_v44 = vadd.f32 -1.0, %v2828_v23 }
 0x159   :  { %v917_v20 = vmul.f32 65504.0, %v2186_v44 }
 0x15a   :  { %v2852_v45 = vpop.permute.xlu1 %786 }
 0x15b   :  { %v2194_v13 = vadd.f32 -1.0, %v2852_v45 }
 0x1df   :  { %v2316_v33 = vpop.f32.mrb[0].mxu1 }
 0x1e0   :  { %v581_v39 = vadd.f32 %v2316_v33, %v2826_v21  ;;  %v575_v40 = vpop.f32.mrb[1].mxu1 }
 0x1e1   :  { %v576_v43 = vadd.f32 %v2826_v21, %v575_v40 }
 0x1e2   :  { %v866_v47 = vmul.f32 %v710_v49, %v581_v39  ;;  %v2882_v39 = vmul.f32 65504.0, %v2205_v6  ;;  %v2895_v6 = vmul.f32 65504.0, %v2198_v22 }
 0x1e3   :  { %v865_v4 = vmul.f32 %v703_v8, %v576_v43  ;;  %v2319_v5 = vpop.f32.mrb[2].mxu1  ;;  %v2885_v43 = vpop.permute.xlu1 %842 }
 0x1e4   :  { %v2865_v10 = vadd.f32 %v914_v14, %v866_v47  ;;  %v591_v12 = vadd.f32 %v2319_v5, %v2826_v21  ;;  %v585_v49 = vpop.f32.mrb[3].mxu1  ;;  %3608 = vst [vmem:[#allocation19_spill] sm:$0xff] %v2882_v39  ;;  %3609 = vst [vmem:[#allocation20_spill] sm:$0xff] %v2885_v43 }
 0x1e5   :  { %v2869_v16 = vadd.f32 %v913_v42, %v865_v4  ;;  %v586_v17 = vadd.f32 %v2826_v21, %v585_v49 }
 0x1e6   :  { %v969_v8 = vsel %vm961_vm10, %v2865_v10, -inf  ;;  %v868_v14 = vmul.f32 %v2793_v59, %v591_v12  ;;  %v2890_v59 = vmul.f32 65504.0, %v2194_v13 }
 0x1e7   :  { %v970_v33 = vrot.slane %v969_v8, 4  ;;  %v962_v38 = vsel %vm961_vm10, %v2869_v16, -inf  ;;  %v867_v40 = vmul.f32 %v2781_v11, %v586_v17  ;;  %v2322_v42 = vpop.f32.mrb[4].mxu1 }
 0x1e8   :  { %v963_v44 = vrot.slane %v962_v38, 4  ;;  %v2887_v47 = vadd.f32 %v916_v41, %v868_v14  ;;  %v601_v48 = vadd.f32 %v2322_v42, %v2826_v21  ;;  %v595_v4 = vpop.f32.mrb[5].mxu1  ;;  %v2901_v41 = vadd.f32 -1.0, %v2885_v43 }
 0x1e9   :  { %v971_v1 = vmax.f32 %v969_v8, %v970_v33  ;;  %v2892_v5 = vadd.f32 %v915_v25, %v867_v40  ;;  %v596_v12 = vadd.f32 %v2826_v21, %v595_v4 }
 0x1ea   :  { %v964_v49 = vmax.f32 %v962_v38, %v963_v44  ;;  %v983_v11 = vsel %vm961_vm10, %v2887_v47, -inf  ;;  %v870_v17 = vmul.f32 %v2773_v50, %v601_v48 }
 0x1eb   :  { %v972_v14 = vrot.slane %v971_v1, 2  ;;  %v984_v42 = vrot.slane %v983_v11, 4  ;;  %v976_v13 = vsel %vm961_vm10, %v2892_v5, -inf  ;;  %v869_v25 = vmul.f32 %v2828_v23, %v596_v12  ;;  %v2325_v8 = vpop.f32.mrb[6].mxu1 }
 0x1ec   :  { %v965_v33 = vrot.slane %v964_v49, 2  ;;  %v977_v22 = vrot.slane %v976_v13, 4  ;;  %v2907_v38 = vadd.f32 %v2818_v18, %v870_v17  ;;  %v611_v40 = vadd.f32 %v2325_v8, %v2826_v21  ;;  %v605_v44 = vpop.f32.mrb[7].mxu1 }
 0x1ed   :  { %v973_v50 = vmax.f32 %v971_v1, %v972_v14  ;;  %v985_v48 = vmax.f32 %v983_v11, %v984_v42  ;;  %v2910_v4 = vadd.f32 %v917_v20, %v869_v25  ;;  %v606_v36 = vadd.f32 %v2826_v21, %v605_v44 }
 0x1ee   :  { %v966_v37 = vmax.f32 %v964_v49, %v965_v33  ;;  %v978_v35 = vmax.f32 %v976_v13, %v977_v22  ;;  %v997_v23 = vsel %vm961_vm10, %v2907_v38, -inf  ;;  %v872_v12 = vmul.f32 %v2795_v60, %v611_v40 }
 0x1ef   :  { %v974_v39 = vrot.slane %v973_v50, 1  ;;  %v986_v58 = vrot.slane %v985_v48, 2  ;;  %v998_v18 = vrot.slane %v997_v23, 4  ;;  %v990_v17 = vsel %vm961_vm10, %v2910_v4, -inf  ;;  %v2328_v8 = vpop.f32.mrb[8].mxu1 }
 0x1f0   :  { %v967_v1 = vrot.slane %v966_v37, 1  ;;  %v979_v11 = vrot.slane %v978_v35, 2  ;;  %v991_v20 = vrot.slane %v990_v17, 4  ;;  %v2919_v14 = vadd.f32 %v2854_v46, %v872_v12  ;;  %v615_v49 = vpop.f32.mrb[9].mxu1 }
 0x1f1   :  { %v975_v42 = vmax.f32 %v973_v50, %v974_v39  ;;  %v987_v13 = vmax.f32 %v985_v48, %v986_v58  ;;  %v999_v25 = vmax.f32 %v997_v23, %v998_v18  ;;  %v871_v33 = vmul.f32 %v2783_v54, %v606_v36 }
 0x1f2   :  { %v968_v60 = vmax.f32 %v966_v37, %v967_v1  ;;  %v980_v22 = vmax.f32 %v978_v35, %v979_v11  ;;  %v992_v40 = vmax.f32 %v990_v17, %v991_v20  ;;  %v1011_v44 = vsel %vm961_vm10, %v2919_v14, -inf }
 0x1f3   :  { %v1131_v0 = vsub.f32 %v2865_v10, %v975_v42  ;;  %v988_v43 = vrot.slane %v987_v13, 1  ;;  %v1000_v26 = vrot.slane %v999_v25, 2  ;;  %v1012_v53 = vrot.slane %v1011_v44, 4  ;;  %v2331_v34 = vpop.f32.mrb[10].mxu1 }
 0x1f4   :  { %v1130_v46 = vsub.f32 %v2869_v16, %v968_v60  ;;  %v981_v12 = vrot.slane %v980_v22, 1  ;;  %v993_v39 = vrot.slane %v992_v40, 2  ;;  %v2927_v58 = vadd.f32 %v2839_v30, %v871_v33  ;;  %v625_v36 = vpop.f32.mrb[11].mxu1 }
 0x1f5   :  { %v1156_v37 = vmul.f32 1.442695, %v1131_v0  ;;  %v989_v54 = vmax.f32 %v987_v13, %v988_v43  ;;  %v1001_v35 = vmax.f32 %v999_v25, %v1000_v26  ;;  %v1013_v50 = vmax.f32 %v1011_v44, %v1012_v53 }
 0x1f6   :  { %v1154_v48 = vmul.f32 1.442695, %v1130_v46  ;;  %v982_v23 = vmax.f32 %v980_v22, %v981_v12  ;;  %v994_v18 = vmax.f32 %v992_v40, %v993_v39  ;;  %v1004_v10 = vsel %vm961_vm10, %v2927_v58, -inf }
 0x1f7   :  { %2375 = vpow2.f32 %v1156_v37  ;;  %v1133_v17 = vsub.f32 %v2887_v47, %v989_v54  ;;  %v1002_v16 = vrot.slane %v1001_v35, 1  ;;  %v1014_v1 = vrot.slane %v1013_v50, 2  ;;  %v2334_v11 = vpop.f32.mrb[12].mxu1 }
 0x1f8   :  { %2377 = vpow2.f32 %v1154_v48  ;;  %v1132_v30 = vsub.f32 %v2892_v5, %v982_v23  ;;  %v995_v20 = vrot.slane %v994_v18, 1  ;;  %v1005_v0 = vrot.slane %v1004_v10, 4  ;;  %v2933_v43 = vpop.f32.mrb[13].mxu1 }
 0x1f9   :  { %v1160_v53 = vmul.f32 1.442695, %v1133_v17  ;;  %v1003_v26 = vmax.f32 %v1001_v35, %v1002_v16  ;;  %v1015_v42 = vmax.f32 %v1013_v50, %v1014_v1  ;;  %v621_v13 = vadd.f32 %v2328_v8, %v2826_v21 }
 0x1fa   :  { %v1158_v25 = vmul.f32 1.442695, %v1132_v30  ;;  %v996_v33 = vmax.f32 %v994_v18, %v995_v20  ;;  %v1006_v60 = vmax.f32 %v1004_v10, %v1005_v0  ;;  %v616_v47 = vadd.f32 %v2826_v21, %v615_v49 }
 0x1fb   :  { %2379 = vpow2.f32 %v1160_v53  ;;  %v1135_v22 = vsub.f32 %v2907_v38, %v1003_v26  ;;  %v1016_v40 = vrot.slane %v1015_v42, 1  ;;  %v874_v5 = vmul.f32 %v2771_v9, %v621_v13  ;;  %v2939_v44 = vpop.f32.mrb[14].mxu1 }
 0x1fc   :  { %2381 = vpow2.f32 %v1158_v25  ;;  %v1134_v46 = vsub.f32 %v2910_v4, %v996_v33  ;;  %v1007_v12 = vrot.slane %v1006_v60, 2  ;;  %v873_v39 = vmul.f32 %v2835_v28, %v616_v47  ;;  %v2943_v8 = vpop.f32.mrb[15].mxu1 }
 0x1fd   :  { %v1164_v37 = vmul.f32 1.442695, %v1135_v22  ;;  %v1017_v54 = vmax.f32 %v1015_v42, %v1016_v40  ;;  %v2946_v49 = vadd.f32 %v2814_v15, %v874_v5  ;;  %v631_v38 = vadd.f32 %v2331_v34, %v2826_v21 }
 0x1fe   :  { %v1162_v35 = vmul.f32 1.442695, %v1134_v46  ;;  %v1008_v50 = vmax.f32 %v1006_v60, %v1007_v12  ;;  %v2950_v9 = vadd.f32 %v2878_v32, %v873_v39  ;;  %v626_v48 = vadd.f32 %v2826_v21, %v625_v36 }
 0x1ff   :  { %2383 = vpow2.f32 %v1164_v37  ;;  %v1137_v4 = vsub.f32 %v2919_v14, %v1017_v54  ;;  %v1025_v28 = vsel %vm961_vm10, %v2946_v49, -inf  ;;  %v876_v23 = vmul.f32 %v2797_v61, %v631_v38  ;;  %v2957_v18 = vpop.f32.mrb[16].mxu1 }
 0x200   :  { %2385 = vpow2.f32 %v1162_v35  ;;  %v1009_v15 = vrot.slane %v1008_v50, 1  ;;  %v1026_v34 = vrot.slane %v1025_v28, 4  ;;  %v1018_v10 = vsel %vm961_vm10, %v2950_v9, -inf  ;;  %v2961_v32 = vpop.f32.mrb[17].mxu1 }
 0x201   :  { %v2963_v17 = vpop.eup %2375  ;;  %v1168_v36 = vmul.f32 1.442695, %v1137_v4  ;;  %v1019_v16 = vrot.slane %v1018_v10, 4  ;;  %v2966_v14 = vadd.f32 %v2860_v3, %v876_v23  ;;  %v875_v1 = vmul.f32 %v2785_v55, %v626_v48 }
 0x202   :  { %v2969_v61 = vpop.eup %2377  ;;  %v2973_v30 = vsel %vm961_vm10, %v2963_v17, 0.0  ;;  %v1010_v20 = vmax.f32 %v1008_v50, %v1009_v15  ;;  %v1027_v0 = vmax.f32 %v1025_v28, %v1026_v34  ;;  %v641_v53 = vadd.f32 %v2334_v11, %v2826_v21 }
 0x203   :  { %v1210_v26 = vrot.slane %v2973_v30, 4  ;;  %2387 = vpow2.f32 %v1168_v36  ;;  %v1020_v42 = vmax.f32 %v1018_v10, %v1019_v16  ;;  %v2977_v13 = vpop.f32.mrb[18].mxu1  ;;  %v2980_v3 = vmul.f32 65504.0, %v2901_v41 }
 0x204   :  { %v2984_v55 = vsel %vm961_vm10, %v2969_v61, 0.0  ;;  %v1136_v25 = vsub.f32 %v2927_v58, %v1010_v20  ;;  %v1028_v33 = vrot.slane %v1027_v0, 2  ;;  %v1039_v60 = vsel %vm961_vm10, %v2966_v14, -inf  ;;  %v2989_v11 = vpop.f32.mrb[19].mxu1 }
 0x205   :  { %v2991_v47 = vpop.eup %2379  ;;  %v1021_v22 = vrot.slane %v1020_v42, 2  ;;  %v1040_v40 = vrot.slane %v1039_v60, 4  ;;  %v2994_v5 = vadd.f32 %v2837_v29, %v875_v1  ;;  %v878_v41 = vmul.f32 %v2775_v51, %v641_v53 }
 0x206   :  { %v2997_v46 = vpop.eup %2381  ;;  %v3001_v58 = vsel %vm961_vm10, %v2991_v47, 0.0  ;;  %v1166_v12 = vmul.f32 1.442695, %v1136_v25  ;;  %v1029_v39 = vmax.f32 %v1027_v0, %v1028_v33  ;;  %v636_v37 = vadd.f32 %v2826_v21, %v2933_v43 }
 0x207   :  { %v1224_v38 = vrot.slane %v3001_v58, 4  ;;  %v1022_v35 = vmax.f32 %v1020_v42, %v1021_v22  ;;  %v1041_v29 = vmax.f32 %v1039_v60, %v1040_v40  ;;  %v3007_v50 = vpop.f32.mrb[20].mxu1  ;;  %v3011_v51 = vsel %vm961_vm10, %v2997_v46, 0.0 }
 0x208   :  { %2389 = vpow2.f32 %v1166_v12  ;;  %v1030_v48 = vrot.slane %v1029_v39, 1  ;;  %v1032_v4 = vsel %vm961_vm10, %v2994_v5, -inf  ;;  %v3015_v28 = vpop.f32.mrb[21].mxu1  ;;  %v3020_v10 = vadd.f32 %v2820_v19, %v878_v41 }
 0x209   :  { %v3017_v43 = vpop.eup %2383  ;;  %v1023_v23 = vrot.slane %v1022_v35, 1  ;;  %v1042_v15 = vrot.slane %v1041_v29, 2  ;;  %v1033_v34 = vrot.slane %v1032_v4, 4  ;;  %v877_v20 = vmul.f32 %v2852_v45, %v636_v37 }
 0x20a   :  { %v3022_v36 = vpop.eup %2385  ;;  %v3026_v16 = vsel %vm961_vm10, %v3017_v43, 0.0  ;;  %v1031_v1 = vmax.f32 %v1029_v39, %v1030_v48  ;;  %v651_v0 = vadd.f32 %v2939_v44, %v2826_v21  ;;  %v1217_v53 = vrot.slane %v3011_v51, 4 }
 0x20b   :  { %v3034_v42 = vsel %vm961_vm10, %v3022_v36, 0.0  ;;  %v1024_v19 = vmax.f32 %v1022_v35, %v1023_v23  ;;  %v1043_v25 = vmax.f32 %v1041_v29, %v1042_v15  ;;  %v3036_v33 = vpop.f32.mrb[22].mxu1  ;;  %v1238_v60 = vrot.slane %v3026_v16, 4 }
 0x20c   :  { %v1139_v22 = vsub.f32 %v2946_v49, %v1031_v1  ;;  %v1034_v40 = vmax.f32 %v1032_v4, %v1033_v34  ;;  %v1053_v45 = vsel %vm961_vm10, %v3020_v10, -inf  ;;  %v3042_v41 = vpop.f32.mrb[23].mxu1  ;;  %v3048_v35 = vadd.f32 %v2890_v59, %v877_v20 }
 0x20d   :  { %v3044_v44 = vpop.eup %2387  ;;  %v1138_v12 = vsub.f32 %v2950_v9, %v1024_v19  ;;  %v1044_v39 = vrot.slane %v1043_v25, 1  ;;  %v1054_v37 = vrot.slane %v1053_v45, 4  ;;  %v880_v49 = vmul.f32 %v2799_v62, %v651_v0 }
 0x20e   :  { %v1172_v48 = vmul.f32 1.442695, %v1139_v22  ;;  %v1035_v23 = vrot.slane %v1034_v40, 2  ;;  %v3054_v4 = vsel %vm961_vm10, %v3044_v44, 0.0  ;;  %v1046_v19 = vsel %vm961_vm10, %v3048_v35, -inf }
 0x20f   :  { %v1170_v15 = vmul.f32 1.442695, %v1138_v12  ;;  %v1045_v34 = vmax.f32 %v1043_v25, %v1044_v39  ;;  %v1055_v1 = vmax.f32 %v1053_v45, %v1054_v37  ;;  %v3059_v59 = vadd.f32 %v2875_v27, %v880_v49 }
 0x210   :  { %2391 = vpow2.f32 %v1172_v48  ;;  %v1036_v9 = vmax.f32 %v1034_v40, %v1035_v23  ;;  %v1047_v62 = vrot.slane %v1046_v19, 4  ;;  %v646_v40 = vadd.f32 %v2826_v21, %v2943_v8 }
 0x211   :  { %2393 = vpow2.f32 %v1170_v15  ;;  %v1141_v20 = vsub.f32 %v2966_v14, %v1045_v34  ;;  %v1056_v22 = vrot.slane %v1055_v1, 2  ;;  %v1067_v25 = vsel %vm961_vm10, %v3059_v59, -inf }
 0x212   :  { %v3062_v0 = vpop.eup %2389  ;;  %v1037_v29 = vrot.slane %v1036_v9, 1  ;;  %v661_v45 = vadd.f32 %v2957_v18, %v2826_v21  ;;  %v1252_v27 = vrot.slane %v3054_v4, 4  ;;  %v1048_v37 = vmax.f32 %v1046_v19, %v1047_v62 }
 0x213   :  { %v1176_v12 = vmul.f32 1.442695, %v1141_v20  ;;  %v1057_v39 = vmax.f32 %v1055_v1, %v1056_v22  ;;  %v3073_v14 = vsel %vm961_vm10, %v3062_v0, 0.0  ;;  %v1068_v23 = vrot.slane %v1067_v25, 4 }
 0x214   :  { %v1038_v48 = vmax.f32 %v1036_v9, %v1037_v29  ;;  %v879_v49 = vmul.f32 %v2787_v56, %v646_v40  ;;  %v1049_v34 = vrot.slane %v1048_v37, 2  ;;  %v882_v8 = vmul.f32 %v2777_v52, %v661_v45 }
 0x215   :  { %2395 = vpow2.f32 %v1176_v12  ;;  %v1058_v15 = vrot.slane %v1057_v39, 1  ;;  %v1069_v54 = vmax.f32 %v1067_v25, %v1068_v23  ;;  %v656_v1 = vadd.f32 %v2826_v21, %v2961_v32 }
 0x216   :  { %v1140_v18 = vsub.f32 %v2994_v5, %v1038_v48  ;;  %v3079_v20 = vadd.f32 %v2841_v31, %v879_v49  ;;  %v1050_v22 = vmax.f32 %v1048_v37, %v1049_v34  ;;  %v3084_v29 = vadd.f32 %v2830_v24, %v882_v8 }
 0x217   :  { %v1059_v19 = vmax.f32 %v1057_v39, %v1058_v15  ;;  %v671_v56 = vadd.f32 %v2977_v13, %v2826_v21  ;;  %v1070_v62 = vrot.slane %v1069_v54, 2  ;;  %v881_v5 = vmul.f32 %v2858_v2, %v656_v1 }
 0x218   :  { %v1174_v9 = vmul.f32 1.442695, %v1140_v18  ;;  %v1060_v52 = vsel %vm961_vm10, %v3079_v20, -inf  ;;  %v1051_v25 = vrot.slane %v1050_v22, 1  ;;  %v1081_v32 = vsel %vm961_vm10, %v3084_v29, -inf }
 0x219   :  { %v1143_v31 = vsub.f32 %v3020_v10, %v1059_v19  ;;  %v1061_v40 = vrot.slane %v1060_v52, 4  ;;  %v1071_v24 = vmax.f32 %v1069_v54, %v1070_v62  ;;  %v1082_v12 = vrot.slane %v1081_v32, 4 }
 0x21a   :  { %v3094_v45 = vpop.eup %2391  ;;  %2397 = vpow2.f32 %v1174_v9  ;;  %v3097_v13 = vadd.f32 %v2895_v6, %v881_v5  ;;  %v1052_v37 = vmax.f32 %v1050_v22, %v1051_v25  ;;  %v1245_v23 = vrot.slane %v3073_v14, 4 }
 0x21b   :  { %v3099_v39 = vpop.eup %2393  ;;  %v3103_v2 = vsel %vm961_vm10, %v3094_v45, 0.0  ;;  %v1180_v10 = vmul.f32 1.442695, %v1143_v31  ;;  %v1062_v48 = vmax.f32 %v1060_v52, %v1061_v40  ;;  %v1072_v15 = vrot.slane %v1071_v24, 1 }
 0x21c   :  { %v1083_v34 = vmax.f32 %v1081_v32, %v1082_v12  ;;  %v3109_v54 = vsel %vm961_vm10, %v3099_v39, 0.0  ;;  %v1142_v6 = vsub.f32 %v3048_v35, %v1052_v37  ;;  %v1074_v19 = vsel %vm961_vm10, %v3097_v13, -inf }
 0x21d   :  { %2399 = vpow2.f32 %v1180_v10  ;;  %v1063_v8 = vrot.slane %v1062_v48, 2  ;;  %v1073_v18 = vmax.f32 %v1071_v24, %v1072_v15  ;;  %v884_v22 = vmul.f32 %v2801_v63, %v671_v56 }
 0x21e   :  { %v1084_v1 = vrot.slane %v1083_v34, 2  ;;  %v1178_v62 = vmul.f32 1.442695, %v1142_v6  ;;  %v1075_v5 = vrot.slane %v1074_v19, 4  ;;  %v666_v31 = vadd.f32 %v2826_v21, %v2989_v11 }
 0x21f   :  { %v3115_v9 = vpop.eup %2395  ;;  %v1064_v52 = vmax.f32 %v1062_v48, %v1063_v8  ;;  %v1145_v35 = vsub.f32 %v3059_v59, %v1073_v18  ;;  %v3122_v32 = vadd.f32 %v2863_v7, %v884_v22  ;;  %v681_v7 = vadd.f32 %v3007_v50, %v2826_v21  ;;  %v3610_v8 = vld [vmem:[#allocation17_spill] sm:$0xff] }
 0x220   :  { %v1085_v40 = vmax.f32 %v1083_v34, %v1084_v1  ;;  %v3126_v24 = vsel %vm961_vm10, %v3115_v9, 0.0  ;;  %2401 = vpow2.f32 %v1178_v62  ;;  %v1076_v56 = vmax.f32 %v1074_v19, %v1075_v5 }
 0x221   :  { %v1065_v63 = vrot.slane %v1064_v52, 1  ;;  %v1184_v12 = vmul.f32 1.442695, %v1145_v35  ;;  %v1095_v11 = vsel %vm961_vm10, %v3122_v32, -inf  ;;  %v883_v37 = vmul.f32 %v2789_v57, %v666_v31  ;;  %v3611_v31 = vld [vmem:[#allocation13_spill] sm:$0xff] }
 0x222   :  { %v1086_v10 = vrot.slane %v1085_v40, 1  ;;  %v1077_v59 = vrot.slane %v1076_v56, 2  ;;  %v1096_v15 = vrot.slane %v1095_v11, 4  ;;  %v676_v1 = vadd.f32 %v2826_v21, %v3015_v28 }
 0x223   :  { %v1066_v48 = vmax.f32 %v1064_v52, %v1065_v63  ;;  %2403 = vpow2.f32 %v1184_v12  ;;  %v3136_v18 = vadd.f32 %v3610_v8, %v883_v37  ;;  %v886_v35 = vmul.f32 %v3611_v31, %v681_v7 }
 0x224   :  { %v3133_v34 = vpop.eup %2397  ;;  %v1087_v6 = vmax.f32 %v1085_v40, %v1086_v10  ;;  %v1078_v22 = vmax.f32 %v1076_v56, %v1077_v59  ;;  %v1097_v62 = vmax.f32 %v1095_v11, %v1096_v15  ;;  %v3612_v56 = vld [vmem:[#allocation16_spill] sm:$0xff] }
 0x225   :  { %v3142_v19 = vsel %vm961_vm10, %v3133_v34, 0.0  ;;  %v1144_v57 = vsub.f32 %v3079_v20, %v1066_v48  ;;  %v1088_v5 = vsel %vm961_vm10, %v3136_v18, -inf  ;;  %v3154_v11 = vadd.f32 %v3612_v56, %v886_v35  ;;  %v3613_v48 = vld [vmem:[#allocation20_spill] sm:$0xff] }
 0x226   :  { %v1147_v52 = vsub.f32 %v3084_v29, %v1087_v6  ;;  %v1079_v63 = vrot.slane %v1078_v22, 1  ;;  %v1098_v12 = vrot.slane %v1097_v62, 2  ;;  %v1089_v10 = vrot.slane %v1088_v5, 4 }
 0x227   :  { %v3150_v40 = vpop.eup %2399  ;;  %v1182_v28 = vmul.f32 1.442695, %v1144_v57  ;;  %v885_v59 = vmul.f32 %v3613_v48, %v676_v1  ;;  %v1109_v8 = vsel %vm961_vm10, %v3154_v11, -inf  ;;  %v691_v56 = vadd.f32 %v3036_v33, %v2826_v21  ;;  %v3614_v48 = vld [vmem:[#allocation15_spill] sm:$0xff] }
 0x228   :  { %v1188_v20 = vmul.f32 1.442695, %v1147_v52  ;;  %v3159_v29 = vsel %vm961_vm10, %v3150_v40, 0.0  ;;  %v1080_v15 = vmax.f32 %v1078_v22, %v1079_v63  ;;  %v1099_v7 = vmax.f32 %v1097_v62, %v1098_v12 }
 0x229   :  { %2405 = vpow2.f32 %v1182_v28  ;;  %v1090_v6 = vmax.f32 %v1088_v5, %v1089_v10  ;;  %v3164_v57 = vadd.f32 %v2980_v3, %v885_v59  ;;  %v1110_v35 = vrot.slane %v1109_v8, 4 }
 0x22a   :  { %2407 = vpow2.f32 %v1188_v20  ;;  %v3166_v52 = vpop.eup %2401  ;;  %v1146_v31 = vsub.f32 %v3097_v13, %v1080_v15  ;;  %v1100_v1 = vrot.slane %v1099_v7, 1  ;;  %v686_v3 = vadd.f32 %v2826_v21, %v3042_v41  ;;  %v3615_v15 = vld [vmem:[#allocation14_spill] sm:$0xff] }
 0x22b   :  { %v3173_v22 = vsel %vm961_vm10, %v3166_v52, 0.0  ;;  %v1091_v62 = vrot.slane %v1090_v6, 2  ;;  %v1102_v5 = vsel %vm961_vm10, %v3164_v57, -inf  ;;  %v1111_v12 = vmax.f32 %v1109_v8, %v1110_v35  ;;  %v3616_v8 = vld [vmem:[#allocation19_spill] sm:$0xff]  ;;  %v3617_v35 = vld [vmem:[#allocation18_spill] sm:$0xff] }
 0x22c   :  { %v1186_v63 = vmul.f32 1.442695, %v1146_v31  ;;  %v1101_v13 = vmax.f32 %v1099_v7, %v1100_v1  ;;  %v1103_v33 = vrot.slane %v1102_v5, 4  ;;  %v888_v59 = vmul.f32 %v3614_v48, %v691_v56 }
 0x22d   :  { %v3180_v10 = vpop.eup %2403  ;;  %v1092_v20 = vmax.f32 %v1090_v6, %v1091_v62  ;;  %v887_v25 = vmul.f32 %v3615_v15, %v686_v3  ;;  %v1112_v49 = vrot.slane %v1111_v12, 2  ;;  %v1211_v62 = vadd.f32 %v1210_v26, %v2973_v30 }
 0x22e   :  { %2409 = vpow2.f32 %v1186_v63  ;;  %v1149_v50 = vsub.f32 %v3122_v32, %v1101_v13  ;;  %v3188_v21 = vsel %vm961_vm10, %v3180_v10, 0.0  ;;  %v1104_v7 = vmax.f32 %v1102_v5, %v1103_v33 }
 0x22f   :  { %v1093_v41 = vrot.slane %v1092_v20, 1  ;;  %v3191_v31 = vadd.f32 %v3616_v8, %v888_v59  ;;  %v1113_v1 = vmax.f32 %v1111_v12, %v1112_v49  ;;  %v3194_v56 = vadd.f32 %v3617_v35, %v887_v25 }
 0x230   :  { %v1192_v6 = vmul.f32 1.442695, %v1149_v50  ;;  %v1105_v3 = vrot.slane %v1104_v7, 2  ;;  %v1225_v5 = vadd.f32 %v1224_v38, %v3001_v58  ;;  %v1308_v58 = vrot.slane %v3188_v21, 4 }
 0x231   :  { %v1094_v32 = vmax.f32 %v1092_v20, %v1093_v41  ;;  %v1123_v63 = vsel %vm961_vm10, %v3191_v31, -inf  ;;  %v1114_v49 = vrot.slane %v1113_v1, 1  ;;  %v1116_v25 = vsel %vm961_vm10, %v3194_v56, -inf }
 0x232   :  { %2411 = vpow2.f32 %v1192_v6  ;;  %v1124_v50 = vrot.slane %v1123_v63, 4  ;;  %v1106_v20 = vmax.f32 %v1104_v7, %v1105_v3  ;;  %v1117_v33 = vrot.slane %v1116_v25, 4 }
 0x233   :  { %v3204_v13 = vpop.eup %2405  ;;  %v1148_v26 = vsub.f32 %v3136_v18, %v1094_v32  ;;  %v1115_v48 = vmax.f32 %v1113_v1, %v1114_v49  ;;  %v1212_v28 = vrot.slane %v1211_v62, 2  ;;  %v1226_v18 = vrot.slane %v1225_v5, 2 }
 0x234   :  { %v3208_v12 = vpop.eup %2407  ;;  %v3212_v30 = vsel %vm961_vm10, %v3204_v13, 0.0  ;;  %v1125_v59 = vmax.f32 %v1123_v63, %v1124_v50  ;;  %v1107_v8 = vrot.slane %v1106_v20, 1  ;;  %v1118_v6 = vmax.f32 %v1116_v25, %v1117_v33 }
 0x235   :  { %v3219_v15 = vsel %vm961_vm10, %v3208_v12, 0.0  ;;  %v1190_v41 = vmul.f32 1.442695, %v1148_v26  ;;  %v1151_v35 = vsub.f32 %v3154_v11, %v1115_v48  ;;  %v1218_v1 = vadd.f32 %v1217_v53, %v3011_v51 }
 0x236   :  { %v1126_v37 = vrot.slane %v1125_v59, 2  ;;  %v1108_v7 = vmax.f32 %v1106_v20, %v1107_v8  ;;  %v1119_v32 = vrot.slane %v1118_v6, 2  ;;  %v1213_v50 = vadd.f32 %v1212_v28, %v1211_v62 }
 0x237   :  { %2413 = vpow2.f32 %v1190_v41  ;;  %v1196_v63 = vmul.f32 1.442695, %v1151_v35  ;;  %v1227_v26 = vadd.f32 %v1226_v18, %v1225_v5  ;;  %v1322_v25 = vrot.slane %v3219_v15, 4 }
 0x238   :  { %v3225_v3 = vpop.eup %2409  ;;  %v1127_v49 = vmax.f32 %v1125_v59, %v1126_v37  ;;  %v1150_v11 = vsub.f32 %v3164_v57, %v1108_v7  ;;  %v1120_v33 = vmax.f32 %v1118_v6, %v1119_v32  ;;  %v1219_v48 = vrot.slane %v1218_v1, 2 }
 0x239   :  { %v3231_v20 = vsel %vm961_vm10, %v3225_v3, 0.0  ;;  %2415 = vpow2.f32 %v1196_v63  ;;  %v1214_v8 = vrot.slane %v1213_v50, 1  ;;  %v1228_v38 = vrot.slane %v1227_v26, 1 }
 0x23a   :  { %v1128_v41 = vrot.slane %v1127_v49, 1  ;;  %v1194_v51 = vmul.f32 1.442695, %v1150_v11  ;;  %v1121_v53 = vrot.slane %v1120_v33, 1  ;;  %v1220_v35 = vadd.f32 %v1219_v48, %v1218_v1 }
 0x23b   :  { %v1215_v62 = vadd.f32 %v1214_v8, %v1213_v50  ;;  %v1253_v57 = vadd.f32 %v1252_v27, %v3054_v4  ;;  %v1239_v5 = vadd.f32 %v1238_v60, %v3026_v16  ;;  %v1315_v59 = vrot.slane %v3231_v20, 4 }
 0x23c   :  { %v3233_v37 = vpop.eup %2411  ;;  %v1129_v28 = vmax.f32 %v1127_v49, %v1128_v41  ;;  %2417 = vpow2.f32 %v1194_v51  ;;  %v1122_v6 = vmax.f32 %v1120_v33, %v1121_v53  ;;  %v1229_v18 = vadd.f32 %v1228_v38, %v1227_v26 }
 0x23d   :  { %v3244_v7 = vsel %vm961_vm10, %v3233_v37, 0.0  ;;  %2419 = vrcp.f32 %v1215_v62  ;;  %v1221_v1 = vrot.slane %v1220_v35, 1  ;;  %v1254_v4 = vrot.slane %v1253_v57, 2 }
 0x23e   :  { %v1153_v32 = vsub.f32 %v3191_v31, %v1129_v28  ;;  %v1152_v63 = vsub.f32 %v3194_v56, %v1122_v6  ;;  %2421 = vrcp.f32 %v1229_v18  ;;  %v1240_v27 = vrot.slane %v1239_v5, 2 }
 0x23f   :  { %v1222_v16 = vadd.f32 %v1221_v1, %v1220_v35  ;;  %v1246_v60 = vadd.f32 %v1245_v23, %v3073_v14  ;;  %v3618_v38 = vrot.slane %v3103_v2, 4  ;;  %v1255_v11 = vadd.f32 %v1254_v4, %v1253_v57 }
 0x240   :  { %v1200_v49 = vmul.f32 1.442695, %v1153_v32  ;;  %v1198_v31 = vmul.f32 1.442695, %v1152_v63  ;;  %v1241_v33 = vadd.f32 %v1240_v27, %v1239_v5  ;;  %v3619_v56 = vrot.slane %v3126_v24, 4 }
 0x241   :  { %v1267_v50 = vadd.f32 %v3618_v38, %v3103_v2  ;;  %v3254_v26 = vpop.eup %2413  ;;  %v1336_v41 = vrot.slane %v3244_v7, 4  ;;  %v1247_v8 = vrot.slane %v1246_v60, 2  ;;  %v1256_v2 = vrot.slane %v1255_v11, 1 }
 0x242   :  { %v1281_v48 = vadd.f32 %v3619_v56, %v3126_v24  ;;  %2423 = vpow2.f32 %v1200_v49  ;;  %v3262_v14 = vsel %vm961_vm10, %v3254_v26, 0.0  ;;  %v1242_v23 = vrot.slane %v1241_v33, 1 }
 0x243   :  { %v1268_v51 = vrot.slane %v1267_v50, 2  ;;  %2425 = vpow2.f32 %v1198_v31  ;;  %v3264_v53 = vpop.eup %2415  ;;  %v1248_v35 = vadd.f32 %v1247_v8, %v1246_v60  ;;  %v1257_v57 = vadd.f32 %v1256_v2, %v1255_v11 }
 0x244   :  { %2427 = vrcp.f32 %v1222_v16  ;;  %v1282_v62 = vrot.slane %v1281_v48, 2  ;;  %v1349_v24 = vsel %vm961_vm10, %v3264_v53, 0.0  ;;  %v1243_v5 = vadd.f32 %v1242_v23, %v1241_v33 }
 0x245   :  { %v1269_v28 = vadd.f32 %v1268_v51, %v1267_v50  ;;  %v3620_v6 = vrot.slane %v3159_v29, 4  ;;  %v1329_v32 = vrot.slane %v3262_v14, 4  ;;  %v1249_v1 = vrot.slane %v1248_v35, 1 }
 0x246   :  { %v1283_v4 = vadd.f32 %v1282_v62, %v1281_v48  ;;  %v3272_v27 = vpop.eup %2417  ;;  %2429 = vrcp.f32 %v1257_v57  ;;  %v3621_v16 = vrot.slane %v3142_v19, 4  ;;  %v1309_v38 = vadd.f32 %v1308_v58, %v3188_v21 }
 0x247   :  { %v1295_v18 = vadd.f32 %v3620_v6, %v3159_v29  ;;  %v1270_v63 = vrot.slane %v1269_v28, 1  ;;  %v2420_v50 = vpop.eup %2419  ;;  %v1350_v31 = vrot.slane %v1349_v24, 4  ;;  %2431 = vrcp.f32 %v1243_v5 }
 0x248   :  { %v1274_v60 = vadd.f32 %v3621_v16, %v3142_v19  ;;  %v1250_v29 = vadd.f32 %v1249_v1, %v1248_v35  ;;  %v2422_v33 = vpop.eup %2421  ;;  %v3282_v56 = vsel %vm961_vm10, %v3272_v27, 0.0  ;;  %v1419_v48 = vmul.f32 %v2420_v50, %v2963_v17 }
 0x249   :  { %v1296_v49 = vrot.slane %v1295_v18, 2  ;;  %v1271_v11 = vadd.f32 %v1270_v63, %v1269_v28  ;;  %v1284_v8 = vrot.slane %v1283_v4, 1  ;;  %v1421_v19 = vmul.f32 %v2422_v33, %v2991_v47 }
 0x24a   :  { %2433 = vrcp.f32 %v1250_v29  ;;  %v1275_v2 = vrot.slane %v1274_v60, 2  ;;  %v1310_v23 = vrot.slane %v1309_v38, 2  ;;  %v1445_v21 = vsel %vm961_vm10, %v1419_v48, 0.0 }
 0x24b   :  { %v1297_v51 = vadd.f32 %v1296_v49, %v1295_v18  ;;  %2435 = vrcp.f32 %v1271_v11  ;;  %v1285_v58 = vadd.f32 %v1284_v8, %v1283_v4  ;;  %1446 = vadd.xlane.f32.xlu0 %v1445_v21  ;;  %v1451_v62 = vsel %vm961_vm10, %v1421_v19, 0.0 }
 0x24c   :  { %v3287_v28 = vpop.eup %2423  ;;  %v1276_v57 = vadd.f32 %v1275_v2, %v1274_v60  ;;  %v1311_v5 = vadd.f32 %v1310_v23, %v1309_v38  ;;  %v3622_v17 = vrot.slane %v3212_v30, 4  ;;  %1452 = vadd.xlane.f32.xlu1 %v1451_v62  ;;  %v1323_v63 = vadd.f32 %v1322_v25, %v3219_v15 }
 0x24d   :  { %v1298_v35 = vrot.slane %v1297_v51, 1  ;;  %v3293_v47 = vpop.eup %2425  ;;  %v3297_v18 = vsel %vm961_vm10, %v3287_v28, 0.0  ;;  %2437 = vrcp.f32 %v1285_v58  ;;  %v1330_v8 = vadd.f32 %v1329_v32, %v3262_v14 }
 0x24e   :  { %v1302_v6 = vadd.f32 %v3622_v17, %v3212_v30  ;;  %v2428_v4 = vpop.eup %2427  ;;  %v1364_v49 = vrot.slane %v3297_v18, 4  ;;  %v1356_v16 = vsel %vm961_vm10, %v3293_v47, 0.0  ;;  %v1277_v30 = vrot.slane %v1276_v57, 1 }
 0x24f   :  { %v1299_v1 = vadd.f32 %v1298_v35, %v1297_v51  ;;  %v1312_v60 = vrot.slane %v1311_v5, 1  ;;  %v1357_v38 = vrot.slane %v1356_v16, 4  ;;  %v1420_v50 = vmul.f32 %v2428_v4, %v2997_v46 }
 0x250   :  { %v1303_v29 = vrot.slane %v1302_v6, 2  ;;  %v1278_v11 = vadd.f32 %v1277_v30, %v1276_v57  ;;  %v1324_v48 = vrot.slane %v1323_v63, 2  ;;  %v2430_v51 = vpop.eup %2429  ;;  %v1351_v19 = vadd.f32 %v1350_v31, %v1349_v24 }
 0x251   :  { %2439 = vrcp.f32 %v1299_v1  ;;  %v1313_v33 = vadd.f32 %v1312_v60, %v1311_v5  ;;  %v1448_v15 = vsel %vm961_vm10, %v1420_v50, 0.0  ;;  %v1337_v2 = vadd.f32 %v1336_v41, %v3244_v7  ;;  %v2432_v23 = vpop.eup %2431 }
 0x252   :  { %v1304_v25 = vadd.f32 %v1303_v29, %v1302_v6  ;;  %1449 = vadd.xlane.f32.xlu1 %v1448_v15  ;;  %v1425_v46 = vmul.f32 %v2430_v51, %v3044_v44  ;;  %2441 = vrcp.f32 %v1278_v11  ;;  %v1325_v21 = vadd.f32 %v1324_v48, %v1323_v63 }
 0x253   :  { %v1331_v58 = vrot.slane %v1330_v8, 2  ;;  %v1423_v35 = vmul.f32 %v2432_v23, %v3017_v43  ;;  %2443 = vrcp.f32 %v1313_v33  ;;  %v1352_v32 = vrot.slane %v1351_v19, 2 }
 0x254   :  { %v1305_v14 = vrot.slane %v1304_v25, 1  ;;  %v2434_v62 = vpop.eup %2433  ;;  %v1463_v57 = vsel %vm961_vm10, %v1425_v46, 0.0  ;;  %v1326_v24 = vrot.slane %v1325_v21, 1  ;;  %v1338_v5 = vrot.slane %v1337_v2, 2 }
 0x255   :  { %v1332_v31 = vadd.f32 %v1331_v58, %v1330_v8  ;;  %v2436_v17 = vpop.eup %2435  ;;  %1464 = vadd.xlane.f32.xlu0 %v1463_v57  ;;  %v1457_v7 = vsel %vm961_vm10, %v1423_v35, 0.0  ;;  %v1424_v44 = vmul.f32 %v2434_v62, %v3062_v0  ;;  %v1353_v6 = vadd.f32 %v1352_v32, %v1351_v19 }
 0x256   :  { %v1306_v41 = vadd.f32 %v1305_v14, %v1304_v25  ;;  %1458 = vadd.xlane.f32.xlu1 %v1457_v7  ;;  %v1427_v43 = vmul.f32 %v2436_v17, %v3094_v45  ;;  %v1327_v1 = vadd.f32 %v1326_v24, %v1325_v21  ;;  %v1339_v4 = vadd.f32 %v1338_v5, %v1337_v2 }
 0x257   :  { %v1333_v63 = vrot.slane %v1332_v31, 1  ;;  %v2438_v30 = vpop.eup %2437  ;;  %v1460_v60 = vsel %vm961_vm10, %v1424_v44, 0.0  ;;  %v1354_v50 = vrot.slane %v1353_v6, 1  ;;  %v1358_v29 = vadd.f32 %v1357_v38, %v1356_v16 }
 0x258   :  { %2445 = vrcp.f32 %v1306_v41  ;;  %v1469_v11 = vsel %vm961_vm10, %v1427_v43, 0.0  ;;  %v1429_v33 = vmul.f32 %v2438_v30, %v3115_v9  ;;  %v1340_v51 = vrot.slane %v1339_v4, 1 }
 0x259   :  { %2447 = vrcp.f32 %v1327_v1  ;;  %v1334_v0 = vadd.f32 %v1333_v63, %v1332_v31  ;;  %1461 = vadd.xlane.f32.xlu0 %v1460_v60  ;;  %v1355_v8 = vadd.f32 %v1354_v50, %v1353_v6  ;;  %v1359_v45 = vrot.slane %v1358_v29, 2 }
 0x25a   :  { %v3623_v15 = vrot.slane %v2984_v55, 4  ;;  %v1475_v19 = vsel %vm961_vm10, %v1429_v33, 0.0  ;;  %v1365_v16 = vadd.f32 %v1364_v49, %v3297_v18  ;;  %v1341_v9 = vadd.f32 %v1340_v51, %v1339_v4 }
 0x25b   :  { %v2440_v48 = vpop.eup %2439  ;;  %2449 = vrcp.f32 %v1334_v0  ;;  %1476 = vadd.xlane.f32.xlu1 %v1475_v19  ;;  %v1360_v38 = vadd.f32 %v1359_v45, %v1358_v29  ;;  %v3624_v35 = vrot.slane %v3109_v54, 4  ;;  %v3625_v14 = vrot.slane %v3034_v42, 4 }
 0x25c   :  { %v1204_v25 = vadd.f32 %v3623_v15, %v2984_v55  ;;  %v1431_v2 = vmul.f32 %v2440_v48, %v3150_v40  ;;  %2451 = vrcp.f32 %v1355_v8  ;;  %v2442_v46 = vpop.eup %2441  ;;  %v1366_v58 = vrot.slane %v1365_v16, 2 }
 0x25d   :  { %v1260_v55 = vadd.f32 %v3624_v35, %v3109_v54  ;;  %v1232_v40 = vadd.f32 %v3625_v14, %v3034_v42  ;;  %v2444_v32 = vpop.eup %2443  ;;  %1470 = vadd.xlane.f32.xlu0 %v1469_v11  ;;  %v1428_v18 = vmul.f32 %v2442_v46, %v3133_v34  ;;  %2453 = vrcp.f32 %v1341_v9 }
 0x25e   :  { %v1205_v23 = vrot.slane %v1204_v25, 2  ;;  %v1481_v21 = vsel %vm961_vm10, %v1431_v2, 0.0  ;;  %v1361_v49 = vrot.slane %v1360_v38, 1  ;;  %v1433_v57 = vmul.f32 %v2444_v32, %v3180_v10 }
 0x25f   :  { %v1367_v24 = vadd.f32 %v1366_v58, %v1365_v16  ;;  %v1261_v31 = vrot.slane %v1260_v55, 2  ;;  %v1233_v5 = vrot.slane %v1232_v40, 2  ;;  %v1472_v17 = vsel %vm961_vm10, %v1428_v18, 0.0 }
 0x260   :  { %v1206_v62 = vadd.f32 %v1205_v23, %v1204_v25  ;;  %v1362_v7 = vadd.f32 %v1361_v49, %v1360_v38  ;;  %v1316_v42 = vadd.f32 %v1315_v59, %v3231_v20  ;;  %v1343_v44 = vrot.slane %v3282_v56, 4  ;;  %1473 = vadd.xlane.f32.xlu1 %v1472_v17 }
 0x261   :  { %v1368_v34 = vrot.slane %v1367_v24, 1  ;;  %v1262_v41 = vadd.f32 %v1261_v31, %v1260_v55  ;;  %v1234_v6 = vadd.f32 %v1233_v5, %v1232_v40  ;;  %1482 = vadd.xlane.f32.xlu0 %v1481_v21  ;;  %v3626_v63 = vrot.slane %v3173_v22, 4 }
 0x262   :  { %v1207_v54 = vrot.slane %v1206_v62, 1  ;;  %v2446_v43 = vpop.eup %2445  ;;  %2455 = vrcp.f32 %v1362_v7  ;;  %v1317_v1 = vrot.slane %v1316_v42, 2  ;;  %v1487_v60 = vsel %vm961_vm10, %v1433_v57, 0.0 }
 0x263   :  { %v1288_v4 = vadd.f32 %v3626_v63, %v3173_v22  ;;  %v2448_v30 = vpop.eup %2447  ;;  %v1369_v50 = vadd.f32 %v1368_v34, %v1367_v24  ;;  %v1263_v20 = vrot.slane %v1262_v41, 1  ;;  %v1235_v59 = vrot.slane %v1234_v6, 1 }
 0x264   :  { %v1208_v10 = vadd.f32 %v1207_v54, %v1206_v62  ;;  %v1435_v29 = vmul.f32 %v2448_v30, %v3208_v12  ;;  %v1318_v11 = vadd.f32 %v1317_v1, %v1316_v42  ;;  %v1432_v48 = vmul.f32 %v2446_v43, %v3204_v13  ;;  %v1540_v43 = vld [vmem:[#allocation6 + $0x8] sm:$0xff]  ;;  %v1542_v1 = vld [vmem:[#allocation6 + $0x18] sm:$0xff] }
 0x265   :  { %v1289_v33 = vrot.slane %v1288_v4, 2  ;;  %v2450_v0 = vpop.eup %2449  ;;  %v1264_v8 = vadd.f32 %v1263_v20, %v1262_v41  ;;  %v1236_v51 = vadd.f32 %v1235_v59, %v1234_v6  ;;  %1488 = vadd.xlane.f32.xlu0 %v1487_v60  ;;  %v1344_v2 = vadd.f32 %v1343_v44, %v3282_v56  ;;  %v1541_v59 = vld [vmem:[#allocation6 + $0x10] sm:$0xff] }
 0x266   :  { %2457 = vrcp.f32 %v1208_v10  ;;  %v2452_v45 = vpop.eup %2451  ;;  %v1493_v22 = vsel %vm961_vm10, %v1435_v29, 0.0  ;;  %v1436_v15 = vmul.f32 %v2450_v0, %v3254_v26  ;;  %v1319_v25 = vrot.slane %v1318_v11, 1 }
 0x267   :  { %2459 = vrcp.f32 %v1369_v50  ;;  %v1290_v19 = vadd.f32 %v1289_v33, %v1288_v4  ;;  %1494 = vadd.xlane.f32.xlu1 %v1493_v22  ;;  %v1439_v12 = vmul.f32 %v2452_v45, %v3264_v53  ;;  %v2454_v16 = vpop.eup %2453  ;;  %v1484_v23 = vsel %vm961_vm10, %v1432_v48, 0.0  ;;  %v1546_v45 = vld [vmem:[#allocation6 + $0x38] sm:$0xff] }
 0x268   :  { %2461 = vrcp.f32 %v1264_v8  ;;  %v1496_v13 = vsel %vm961_vm10, %v1436_v15, 0.0  ;;  %v1320_v9 = vadd.f32 %v1319_v25, %v1318_v11  ;;  %v1345_v46 = vrot.slane %v1344_v2, 2 }
 0x269   :  { %2463 = vrcp.f32 %v1236_v51  ;;  %v1291_v38 = vrot.slane %v1290_v19, 1  ;;  %1485 = vadd.xlane.f32.xlu0 %v1484_v23  ;;  %v1437_v26 = vmul.f32 %v2454_v16, %v3233_v37  ;;  %v1505_v53 = vsel %vm961_vm10, %v1439_v12, 0.0 }
 0x26a   :  { %2465 = vrcp.f32 %v1320_v9  ;;  %v1346_v58 = vadd.f32 %v1345_v46, %v1344_v2 }
 0x26b   :  { %v1292_v21 = vadd.f32 %v1291_v38, %v1290_v19  ;;  %1497 = vadd.xlane.f32.xlu1 %v1496_v13  ;;  %v1499_v40 = vsel %vm961_vm10, %v1437_v26, 0.0  ;;  %v1544_v19 = vld [vmem:[#allocation6 + $0x28] sm:$0xff] }
 0x26c   :  { %v2456_v35 = vpop.eup %2455  ;;  %v1347_v55 = vrot.slane %v1346_v58, 1 }
 0x26d   :  { %2467 = vrcp.f32 %v1292_v21  ;;  %v1440_v56 = vmul.f32 %v2456_v35, %v3293_v47  ;;  %1506 = vadd.xlane.f32.xlu0 %v1505_v53  ;;  %v1545_v53 = vld [vmem:[#allocation6 + $0x30] sm:$0xff] }
 0x26e   :  { %v1348_v49 = vadd.f32 %v1347_v55, %v1346_v58 }
 0x26f   :  { %1500 = vadd.xlane.f32.xlu1 %v1499_v40  ;;  %v1508_v18 = vsel %vm961_vm10, %v1440_v56, 0.0  ;;  %v3627_v40 = vld [vmem:[#allocation12_spill] sm:$0xff] }
 0x270   :  { %v2458_v14 = vpop.eup %2457  ;;  %2469 = vrcp.f32 %v1348_v49 }
 0x271   :  { %v2460_v32 = vpop.eup %2459  ;;  %v1418_v37 = vmul.f32 %v2458_v14, %v2969_v61  ;;  %1509 = vadd.xlane.f32.xlu0 %v1508_v18 }
 0x272   :  { %v2462_v62 = vpop.eup %2461  ;;  %v1441_v57 = vmul.f32 %v2460_v32, %v3287_v28 }
 0x273   :  { %v2464_v24 = vpop.eup %2463  ;;  %v1442_v47 = vsel %vm961_vm10, %v1418_v37, 0.0  ;;  %v1426_v31 = vmul.f32 %v2462_v62, %v3099_v39 }
 0x274   :  { %1443 = vadd.xlane.f32.xlu1 %v1442_v47  ;;  %v2466_v5 = vpop.eup %2465  ;;  %v1511_v17 = vsel %vm961_vm10, %v1441_v57, 0.0  ;;  %v1422_v7 = vmul.f32 %v2464_v24, %v3022_v36 }
 0x275   :  { %1512 = vadd.xlane.f32.xlu0 %v1511_v17  ;;  %v1466_v61 = vsel %vm961_vm10, %v1426_v31, 0.0  ;;  %v1434_v42 = vmul.f32 %v2466_v5, %v3225_v3  ;;  %v1550_v31 = vld [vmem:[#allocation6 + $0x58] sm:$0xff] }
 0x276   :  { %v1454_v28 = vsel %vm961_vm10, %v1422_v7, 0.0  ;;  %v1548_v7 = vld [vmem:[#allocation6 + $0x48] sm:$0xff] }
 0x277   :  { %v2468_v54 = vpop.eup %2467  ;;  %v1490_v39 = vsel %vm961_vm10, %v1434_v42, 0.0 }
 0x278   :  { %1467 = vadd.xlane.f32.xlu1 %v1466_v61  ;;  %v1430_v44 = vmul.f32 %v2468_v54, %v3166_v52 }
 0x279   :  { %1455 = vadd.xlane.f32.xlu0 %v1454_v28 }
 0x27a   :  { %v2470_v34 = vpop.eup %2469  ;;  %v1478_v41 = vsel %vm961_vm10, %v1430_v44, 0.0 }
 0x27b   :  { %v1438_v36 = vmul.f32 %v2470_v34, %v3272_v27  ;;  %v2547_v27 = vmov 1966171168  }
 0x27c   :  { %1491 = vadd.xlane.f32.xlu1 %v1490_v39  ;;  %v1762_v11 = vunpack.c.l.s4 %v2547_v27 }
 0x27d   :  { %1479 = vadd.xlane.f32.xlu0 %v1478_v41  ;;  %v1502_v6 = vsel %vm961_vm10, %v1438_v36, 0.0 }
 0x27e   :  { %v1763_v2 = vunpack.c.0.s8 %v1762_v11 }
 0x280   :  { %v3376_v32 = vsub.s32 %v1763_v2, %v3627_v40 }
 0x281   :  { %1503 = vadd.xlane.f32.xlu0 %v1502_v6 }
 0x2d8   :  { %v1447_v3 = vpop.xlane.xlu0 %1446 }
 0x2d9   :  { %v1516_v10 = vmul.f32 0.25, %v1447_v3  ;;  %v1453_v63 = vpop.xlane.xlu1 %1452 }
 0x2da   :  { %v1518_v4 = vmul.f32 0.25, %v1453_v63 }
 0x2db   :  { %v1564_v52 = vmul.f32 %v1540_v43, %v1516_v10 }
 0x2dc   :  { %v1566_v30 = vmul.f32 %v1542_v1, %v1518_v4 }
 0x2dd   :  { %v1594_v60 = vsel %vm94_vm0, %v1564_v52, 0.0 }
 0x2de   :  { %v1595_v50 = vrot.slane %v1594_v60, 4  ;;  %v1608_v20 = vsel %vm94_vm0, %v1566_v30, 0.0 }
 0x2df   :  { %v1450_v29 = vpop.xlane.xlu1 %1449  ;;  %v1609_v33 = vrot.slane %v1608_v20, 4 }
 0x2e0   :  { %v1517_v0 = vmul.f32 0.25, %v1450_v29  ;;  %v1596_v48 = vadd.f32 %v1595_v50, %v1594_v60 }
 0x2e1   :  { %v1610_v8 = vadd.f32 %v1609_v33, %v1608_v20  ;;  %v1552_v20 = vld [vmem:[#allocation6 + $0x68] sm:$0xff] }
 0x2e2   :  { %v1565_v51 = vmul.f32 %v1541_v59, %v1517_v0  ;;  %v1465_v22 = vpop.xlane.xlu0 %1464  ;;  %v1597_v15 = vrot.slane %v1596_v48, 2  ;;  %v1549_v0 = vld [vmem:[#allocation6 + $0x50] sm:$0xff] }
 0x2e3   :  { %v1522_v25 = vmul.f32 0.25, %v1465_v22  ;;  %v1459_v12 = vpop.xlane.xlu1 %1458  ;;  %v1611_v16 = vrot.slane %v1610_v8, 2 }
 0x2e4   :  { %v1601_v13 = vsel %vm94_vm0, %v1565_v51, 0.0  ;;  %v1520_v9 = vmul.f32 0.25, %v1459_v12  ;;  %v1598_v38 = vadd.f32 %v1597_v15, %v1596_v48 }
 0x2e5   :  { %v1602_v23 = vrot.slane %v1601_v13, 4  ;;  %v1570_v46 = vmul.f32 %v1546_v45, %v1522_v25  ;;  %v1612_v26 = vadd.f32 %v1611_v16, %v1610_v8 }
 0x2e6   :  { %v1568_v21 = vmul.f32 %v1544_v19, %v1520_v9  ;;  %v1462_v58 = vpop.xlane.xlu0 %1461  ;;  %v1599_v35 = vrot.slane %v1598_v38, 1 }
 0x2e7   :  { %v1603_v56 = vadd.f32 %v1602_v23, %v1601_v13  ;;  %v1636_v55 = vsel %vm94_vm0, %v1570_v46, 0.0  ;;  %v1521_v14 = vmul.f32 0.25, %v1462_v58  ;;  %v1613_v18 = vrot.slane %v1612_v26, 1  ;;  %v1554_v13 = vld [vmem:[#allocation6 + $0x78] sm:$0xff] }
 0x2e8   :  { %v1637_v37 = vrot.slane %v1636_v55, 4  ;;  %v1622_v49 = vsel %vm94_vm0, %v1568_v21, 0.0  ;;  %v1477_v62 = vpop.xlane.xlu1 %1476  ;;  %v1600_v61 = vadd.f32 %v1599_v35, %v1598_v38 }
 0x2e9   :  { %v1604_v57 = vrot.slane %v1603_v56, 2  ;;  %v1623_v24 = vrot.slane %v1622_v49, 4  ;;  %v1569_v47 = vmul.f32 %v1545_v53, %v1521_v14  ;;  %v1526_v5 = vmul.f32 0.25, %v1477_v62 }
 0x2ea   :  { %v1638_v17 = vadd.f32 %v1637_v37, %v1636_v55  ;;  %v1471_v54 = vpop.xlane.xlu0 %1470  ;;  %v1614_v42 = vadd.f32 %v1613_v18, %v1612_v26  ;;  %v1767_v43 = vrot.slane %v1600_v61, %v3376_v32  ;;  %v1553_v61 = vld [vmem:[#allocation6 + $0x70] sm:$0xff] }
 0x2eb   :  { %v1605_v28 = vadd.f32 %v1604_v57, %v1603_v56  ;;  %v1624_v44 = vadd.f32 %v1623_v24, %v1622_v49  ;;  %v1629_v39 = vsel %vm94_vm0, %v1569_v47, 0.0  ;;  %v1524_v34 = vmul.f32 0.25, %v1471_v54  ;;  %v1556_v24 = vld [vmem:[#allocation6 + $0x88] sm:$0xff] }
 0x2ec   :  { %v1639_v41 = vrot.slane %v1638_v17, 2  ;;  %v1630_v36 = vrot.slane %v1629_v39, 4  ;;  %v1574_v6 = vmul.f32 %v1550_v31, %v1526_v5  ;;  %v1811_v4 = vrot.slane %v1614_v42, %v3376_v32 }
 0x2ed   :  { %v1606_v3 = vrot.slane %v1605_v28, 1  ;;  %v1625_v10 = vrot.slane %v1624_v44, 2  ;;  %v1572_v1 = vmul.f32 %v1548_v7, %v1524_v34  ;;  %v1474_v63 = vpop.xlane.xlu1 %1473  ;;  %v1774_v50 = vrot.slane %v1767_v43, %v3376_v32 }
 0x2ee   :  { %v3382_v52 = vadd.f32 %v1639_v41, %v1638_v17  ;;  %v1631_v30 = vadd.f32 %v1630_v36, %v1629_v39  ;;  %v1664_v60 = vsel %vm94_vm0, %v1574_v6, 0.0  ;;  %v1483_v59 = vpop.xlane.xlu0 %1482  ;;  %v1525_v45 = vmul.f32 0.25, %v1474_v63  ;;  %v1557_v63 = vld [vmem:[#allocation6 + $0x90] sm:$0xff] }
 0x2ef   :  { %v1626_v29 = vadd.f32 %v1625_v10, %v1624_v44  ;;  %v1650_v27 = vsel %vm94_vm0, %v1572_v1, 0.0  ;;  %v1665_v11 = vrot.slane %v1664_v60, 4  ;;  %v1528_v33 = vmul.f32 0.25, %v1483_v59  ;;  %1775 = vrot.lane.b32.xlu1 %v1774_v50, %s2548_s6 }
 0x2f0   :  { %v1641_v48 = vrot.slane %v3382_v52, 1  ;;  %v1632_v8 = vrot.slane %v1631_v30, 2  ;;  %v1651_v51 = vrot.slane %v1650_v27, 4  ;;  %v1818_v19 = vrot.slane %v1811_v4, %v3376_v32 }
 0x2f1   :  { %v1627_v22 = vrot.slane %v1626_v29, 1  ;;  %v1666_v15 = vadd.f32 %v1665_v11, %v1664_v60  ;;  %v1576_v25 = vmul.f32 %v1552_v20, %v1528_v33  ;;  %v1573_v16 = vmul.f32 %v1549_v0, %v1525_v45 }
 0x2f2   :  { %v1633_v12 = vadd.f32 %v1632_v8, %v1631_v30  ;;  %v1652_v2 = vadd.f32 %v1651_v51, %v1650_v27  ;;  %v1489_v9 = vpop.xlane.xlu0 %1488  ;;  %v1607_v38 = vadd.f32 %v1606_v3, %v1605_v28  ;;  %1819 = vrot.lane.b32.xlu0 %v1818_v19, %s2549_s28  ;;  %v1642_v43 = vadd.f32 %v1641_v48, %v3382_v52 }
 0x2f3   :  { %v1667_v23 = vrot.slane %v1666_v15, 2  ;;  %v1678_v46 = vsel %vm94_vm0, %v1576_v25, 0.0  ;;  %v1530_v26 = vmul.f32 0.25, %v1489_v9  ;;  %v1628_v53 = vadd.f32 %v1627_v22, %v1626_v29  ;;  %v1560_v25 = vld [vmem:[#allocation6 + $0xa8] sm:$0xff] }
 0x2f4   :  { %v1495_v21 = vpop.xlane.xlu1 %1494  ;;  %v1634_v58 = vrot.slane %v1633_v12, 1  ;;  %v1653_v35 = vrot.slane %v1652_v2, 2  ;;  %v1679_v56 = vrot.slane %v1678_v46, 4  ;;  %v1657_v55 = vsel %vm94_vm0, %v1573_v16, 0.0 }
 0x2f5   :  { %v1668_v14 = vadd.f32 %v1667_v23, %v1666_v15  ;;  %v1658_v40 = vrot.slane %v1657_v55, 4  ;;  %v1578_v18 = vmul.f32 %v1554_v13, %v1530_v26  ;;  %v1789_v37 = vrot.slane %v1607_v38, %v3376_v32 }
 0x2f6   :  { %v3394_v49 = vadd.f32 %v1653_v35, %v1652_v2  ;;  %v1680_v62 = vadd.f32 %v1679_v56, %v1678_v46  ;;  %v1486_v57 = vpop.xlane.xlu0 %1485  ;;  %v1532_v47 = vmul.f32 0.25, %v1495_v21  ;;  %v1834_v31 = vrot.slane %v1628_v53, %v3376_v32 }
 0x2f7   :  { %v1669_v5 = vrot.slane %v1668_v14, 1  ;;  %v1659_v17 = vadd.f32 %v1658_v40, %v1657_v55  ;;  %v1692_v7 = vsel %vm94_vm0, %v1578_v18, 0.0  ;;  %v1796_v54 = vrot.slane %v1789_v37, %v3376_v32 }
 0x2f8   :  { %v1498_v42 = vpop.xlane.xlu1 %1497  ;;  %v1655_v28 = vrot.slane %v3394_v49, 1  ;;  %v1681_v44 = vrot.slane %v1680_v62, 2  ;;  %v1693_v39 = vrot.slane %v1692_v7, 4  ;;  %v1529_v34 = vmul.f32 0.25, %v1486_v57 }
 0x2f9   :  { %v1660_v41 = vrot.slane %v1659_v17, 2  ;;  %1797 = vrot.lane.b32.xlu0 %v1796_v54, %s2550_s30  ;;  %v1580_v36 = vmul.f32 %v1556_v24, %v1532_v47  ;;  %v1841_v6 = vrot.slane %v1834_v31, %v3376_v32  ;;  %v1533_v4 = vmul.f32 0.25, %v1498_v42  ;;  %v1539_v42 = vld [vmem:[#allocation6] sm:$0xff] }
 0x2fa   :  { %v3403_v3 = vadd.f32 %v1681_v44, %v1680_v62  ;;  %v1694_v10 = vadd.f32 %v1693_v39, %v1692_v7  ;;  %v1577_v1 = vmul.f32 %v1553_v61, %v1529_v34  ;;  %v1507_v30 = vpop.xlane.xlu0 %1506  ;;  %v1872_v20 = vrot.slane %v1642_v43, %v3376_v32  ;;  %v1561_v62 = vld [vmem:[#allocation6 + $0xb0] sm:$0xff] }
 0x2fb   :  { %v1661_v60 = vadd.f32 %v1660_v41, %v1659_v17  ;;  %v1706_v50 = vsel %vm94_vm0, %v1580_v36, 0.0  ;;  %v1635_v59 = vadd.f32 %v1634_v58, %v1633_v12  ;;  %v1581_v51 = vmul.f32 %v1557_v63, %v1533_v4  ;;  %v1558_v12 = vld [vmem:[#allocation6 + $0x98] sm:$0xff] }
 0x2fc   :  { %v1501_v29 = vpop.xlane.xlu1 %1500  ;;  %v1683_v27 = vrot.slane %v3403_v3, 1  ;;  %v1695_v11 = vrot.slane %v1694_v10, 2  ;;  %v1685_v33 = vsel %vm94_vm0, %v1577_v1, 0.0  ;;  %v1707_v52 = vrot.slane %v1706_v50, 4 }
 0x2fd   :  { %v1662_v0 = vrot.slane %v1661_v60, 1  ;;  %v1686_v48 = vrot.slane %v1685_v33, 4  ;;  %1842 = vrot.lane.b32.xlu0 %v1841_v6, %s2548_s6  ;;  %v1879_v8 = vrot.slane %v1872_v20, %v3376_v32  ;;  %v1853_v15 = vrot.slane %v1635_v59, %v3376_v32 }
 0x2fe   :  { %v3411_v45 = vadd.f32 %v1695_v11, %v1694_v10  ;;  %v1708_v22 = vadd.f32 %v1707_v52, %v1706_v50  ;;  %v1536_v19 = vmul.f32 0.25, %v1507_v30  ;;  %v1510_v2 = vpop.xlane.xlu0 %1509  ;;  %v1713_v13 = vsel %vm94_vm0, %v1581_v51, 0.0  ;;  %v1562_v11 = vld [vmem:[#allocation6 + $0xb8] sm:$0xff]  ;;  %v1547_v51 = vld [vmem:[#allocation6 + $0x40] sm:$0xff] }
 0x2ff   :  { %v1687_v16 = vadd.f32 %v1686_v48, %v1685_v33  ;;  %1880 = vrot.lane.b32.xlu1 %v1879_v8, %s2549_s28  ;;  %v1534_v9 = vmul.f32 0.25, %v1501_v29  ;;  %v1670_v38 = vadd.f32 %v1669_v5, %v1668_v14  ;;  %v1714_v21 = vrot.slane %v1713_v13, 4 }
 0x300   :  { %v1697_v46 = vrot.slane %v3411_v45, 1  ;;  %v1709_v26 = vrot.slane %v1708_v22, 2  ;;  %v1860_v53 = vrot.slane %v1853_v15, %v3376_v32  ;;  %v1584_v35 = vmul.f32 %v1560_v25, %v1536_v19 }
 0x301   :  { %v1444_v23 = vpop.xlane.xlu1 %1443  ;;  %v1688_v58 = vrot.slane %v1687_v16, 2  ;;  %v1582_v56 = vmul.f32 %v1558_v12, %v1534_v9  ;;  %v1930_v55 = vrot.slane %v1670_v38, %v3376_v32  ;;  %v1715_v18 = vadd.f32 %v1714_v21, %v1713_v13 }
 0x302   :  { %v3419_v40 = vadd.f32 %v1709_v26, %v1708_v22  ;;  %v1656_v37 = vadd.f32 %v1655_v28, %v3394_v49  ;;  %v1537_v57 = vmul.f32 0.25, %v1510_v2  ;;  %v1513_v14 = vpop.xlane.xlu0 %1512  ;;  %v1734_v47 = vsel %vm94_vm0, %v1584_v35, 0.0  ;;  %v1543_v26 = vld [vmem:[#allocation6 + $0x20] sm:$0xff] }
 0x303   :  { %v3422_v24 = vadd.f32 %v1688_v58, %v1687_v16  ;;  %1861 = vrot.lane.b32.xlu1 %v1860_v53, %s2550_s30  ;;  %v1720_v31 = vsel %vm94_vm0, %v1582_v56, 0.0  ;;  %v1937_v5 = vrot.slane %v1930_v55, %v3376_v32  ;;  %v1716_v7 = vrot.slane %v1715_v18, 2 }
 0x304   :  { %v1711_v17 = vrot.slane %v3419_v40, 1  ;;  %v1735_v54 = vrot.slane %v1734_v47, 4  ;;  %v1721_v61 = vrot.slane %v1720_v31, 4  ;;  %v1892_v28 = vrot.slane %v1656_v37, %v3376_v32 }
 0x305   :  { %v1690_v49 = vrot.slane %v3422_v24, 1  ;;  %1938 = vrot.lane.b32.xlu0 %v1937_v5, %s2549_s28  ;;  %v1585_v44 = vmul.f32 %v1561_v62, %v1537_v57  ;;  %v1515_v39 = vmul.f32 0.25, %v1444_v23  ;;  %v1468_v34 = vpop.xlane.xlu1 %1467  ;;  %v3432_v41 = vadd.f32 %v1716_v7, %v1715_v18  ;;  %v1555_v62 = vld [vmem:[#allocation6 + $0x80] sm:$0xff] }
 0x306   :  { %v1736_v36 = vadd.f32 %v1735_v54, %v1734_v47  ;;  %v1722_v6 = vadd.f32 %v1721_v61, %v1720_v31  ;;  %v1663_v43 = vadd.f32 %v1662_v0, %v1661_v60  ;;  %v1899_v10 = vrot.slane %v1892_v28, %v3376_v32  ;;  %v1456_v30 = vpop.xlane.xlu0 %1455 }
 0x307   :  { %v1741_v1 = vsel %vm94_vm0, %v1585_v44, 0.0  ;;  %v1563_v63 = vmul.f32 %v1539_v42, %v1515_v39  ;;  %v1684_v4 = vadd.f32 %v1683_v27, %v3403_v3  ;;  %v1718_v50 = vrot.slane %v3432_v41, 1 }
 0x308   :  { %v1737_v20 = vrot.slane %v1736_v36, 2  ;;  %v1723_v59 = vrot.slane %v1722_v6, 2  ;;  %v1742_v29 = vrot.slane %v1741_v1, 4  ;;  %1900 = vrot.lane.b32.xlu1 %v1899_v10, %s2548_s6  ;;  %v1911_v60 = vrot.slane %v1663_v43, %v3376_v32  ;;  %v1551_v43 = vld [vmem:[#allocation6 + $0x60] sm:$0xff] }
 0x309   :  { %v1587_v33 = vsel %vm94_vm0, %v1563_v63, 0.0  ;;  %v1950_v52 = vrot.slane %v1684_v4, %v3376_v32  ;;  %v1538_v0 = vmul.f32 0.25, %v1513_v14  ;;  %v1523_v19 = vmul.f32 0.25, %v1468_v34  ;;  %v1492_v12 = vpop.xlane.xlu1 %1491 }
 0x30a   :  { %v3442_v48 = vadd.f32 %v1737_v20, %v1736_v36  ;;  %v3444_v8 = vadd.f32 %v1723_v59, %v1722_v6  ;;  %v1743_v3 = vadd.f32 %v1742_v29, %v1741_v1  ;;  %v1588_v27 = vrot.slane %v1587_v33, 4  ;;  %v1480_v56 = vpop.xlane.xlu0 %1479 }
 0x30b   :  { %v1918_v22 = vrot.slane %v1911_v60, %v3376_v32  ;;  %v1957_v15 = vrot.slane %v1950_v52, %v3376_v32  ;;  %v1586_v25 = vmul.f32 %v1562_v11, %v1538_v0  ;;  %v3628_v2 = vlaneseq  ;;  %v1559_v52 = vld [vmem:[#allocation6 + $0xa0] sm:$0xff] }
 0x30c   :  { %v1739_v13 = vrot.slane %v3442_v48, 1  ;;  %v1725_v9 = vrot.slane %v3444_v8, 1  ;;  %v1744_v38 = vrot.slane %v1743_v3, 2  ;;  %v1589_v23 = vadd.f32 %v1588_v27, %v1587_v33 }
 0x30d   :  { %vm3449_vm11 = vcmp.lt.s32.totalorder %v3628_v2, 32  ;;  %1919 = vrot.lane.b32.xlu0 %v1918_v22, %s2550_s30  ;;  %1958 = vrot.lane.b32.xlu1 %v1957_v15, %s2548_s6  ;;  %v1748_v21 = vsel %vm94_vm0, %v1586_v25, 0.0  ;;  %v1571_v53 = vmul.f32 %v1547_v51, %v1523_v19  ;;  %v1698_v58 = vadd.f32 %v1697_v46, %v3411_v45 }
 0x30e   :  { %v1519_v35 = vmul.f32 0.25, %v1456_v30  ;;  %v3461_v55 = vadd.f32 %v1744_v38, %v1743_v3  ;;  %v1590_v18 = vrot.slane %v1589_v23, 2  ;;  %v1749_v37 = vrot.slane %v1748_v21, 4  ;;  %v1504_v63 = vpop.xlane.xlu0 %1503 }
 0x30f   :  { %v1531_v57 = vmul.f32 0.25, %v1492_v12  ;;  %v1643_v14 = vsel %vm94_vm0, %v1571_v53, 0.0  ;;  %v1988_v47 = vrot.slane %v1698_v58, %v3376_v32  ;;  %v1712_v5 = vadd.f32 %v1711_v17, %v3419_v40 }
 0x310   :  { %v1567_v31 = vmul.f32 %v1543_v26, %v1519_v35  ;;  %v1746_v7 = vrot.slane %v3461_v55, 1  ;;  %v1591_v54 = vadd.f32 %v1590_v18, %v1589_v23  ;;  %v1750_v61 = vadd.f32 %v1749_v37, %v1748_v21 }
 0x311   :  { %v1644_v45 = vrot.slane %v1643_v14, 4  ;;  %v1995_v46 = vrot.slane %v1988_v47, %v3376_v32  ;;  %v1579_v28 = vmul.f32 %v1555_v62, %v1531_v57  ;;  %v2008_v44 = vrot.slane %v1712_v5, %v3376_v32 }
 0x312   :  { %v1615_v42 = vsel %vm94_vm0, %v1567_v31, 0.0  ;;  %v1592_v39 = vrot.slane %v1591_v54, 1  ;;  %v1751_v34 = vrot.slane %v1750_v61, 2  ;;  %v1691_v10 = vadd.f32 %v1690_v49, %v3422_v24 }
 0x313   :  { %v1645_v36 = vadd.f32 %v1644_v45, %v1643_v14  ;;  %v1616_v6 = vrot.slane %v1615_v42, 4  ;;  %1996 = vrot.lane.b32.xlu1 %v1995_v46, %s2549_s28  ;;  %v1699_v40 = vsel %vm94_vm0, %v1579_v28, 0.0  ;;  %v2015_v17 = vrot.slane %v2008_v44, %v3376_v32 }
 0x314   :  { %v1527_v1 = vmul.f32 0.25, %v1480_v56  ;;  %v1593_v4 = vadd.f32 %v1592_v39, %v1591_v54  ;;  %v1752_v30 = vadd.f32 %v1751_v34, %v1750_v61  ;;  %v1700_v29 = vrot.slane %v1699_v40, 4 }
 0x315   :  { %v1646_v20 = vrot.slane %v1645_v36, 2  ;;  %v1617_v59 = vadd.f32 %v1616_v6, %v1615_v42  ;;  %2016 = vrot.lane.b32.xlu0 %v2015_v17, %s2548_s6  ;;  %v1969_v11 = vrot.slane %v1691_v10, %v3376_v32  ;;  %v1719_v60 = vadd.f32 %v1718_v50, %v3432_v41 }
 0x316   :  { %v1575_v33 = vmul.f32 %v1551_v43, %v1527_v1  ;;  %v1753_v0 = vrot.slane %v1752_v30, 1  ;;  %v1535_v49 = vmul.f32 0.25, %v1504_v63  ;;  %1759 = vst.msk [vmem:[#allocation8] sm:$0x1] %vm3449_vm11, %v1593_v4  ;;  %v1701_v27 = vadd.f32 %v1700_v29, %v1699_v40 }
 0x317   :  { %v1647_v3 = vadd.f32 %v1646_v20, %v1645_v36  ;;  %v1618_v24 = vrot.slane %v1617_v59, 2  ;;  %v1976_v51 = vrot.slane %v1969_v11, %v3376_v32  ;;  %v2027_v15 = vrot.slane %v1719_v60, %v3376_v32 }
 0x318   :  { %v1671_v22 = vsel %vm94_vm0, %v1575_v33, 0.0  ;;  %v1583_v38 = vmul.f32 %v1559_v52, %v1535_v49  ;;  %v1702_v41 = vrot.slane %v1701_v27, 2  ;;  %v1740_v23 = vadd.f32 %v1739_v13, %v3442_v48 }
 0x319   :  { %v1648_v25 = vrot.slane %v1647_v3, 1  ;;  %v1619_v19 = vadd.f32 %v1618_v24, %v1617_v59  ;;  %v1672_v12 = vrot.slane %v1671_v22, 4  ;;  %1977 = vrot.lane.b32.xlu1 %v1976_v51, %s2550_s30  ;;  %v2034_v50 = vrot.slane %v2027_v15, %v3376_v32 }
 0x31a   :  { %v1726_v26 = vadd.f32 %v1725_v9, %v3444_v8  ;;  %v1727_v35 = vsel %vm94_vm0, %v1583_v38, 0.0  ;;  %v1703_v56 = vadd.f32 %v1702_v41, %v1701_v27  ;;  %v2066_v37 = vrot.slane %v1740_v23, %v3376_v32 }
 0x31b   :  { %v1649_v21 = vadd.f32 %v1648_v25, %v1647_v3  ;;  %v1620_v53 = vrot.slane %v1619_v19, 1  ;;  %v1673_v58 = vadd.f32 %v1672_v12, %v1671_v22  ;;  %2035 = vrot.lane.b32.xlu0 %v2034_v50, %s2550_s30  ;;  %v1728_v18 = vrot.slane %v1727_v35, 4 }
 0x31c   :  { %v2046_v62 = vrot.slane %v1726_v26, %v3376_v32  ;;  %v1747_v48 = vadd.f32 %v1746_v7, %v3461_v55  ;;  %v1754_v13 = vadd.f32 %v1753_v0, %v1752_v30  ;;  %v1704_v8 = vrot.slane %v1703_v56, 1 }
 0x31d   :  { %v1621_v57 = vadd.f32 %v1620_v53, %v1619_v19  ;;  %v1674_v14 = vrot.slane %v1673_v58, 2  ;;  %1884 = vst.msk [vmem:[#allocation8 + $0x2] sm:$0x1] %vm3449_vm11, %v1649_v21  ;;  %v1729_v9 = vadd.f32 %v1728_v18, %v1727_v35  ;;  %v2073_v47 = vrot.slane %v2066_v37, %v3376_v32 }
 0x31e   :  { %v2053_v31 = vrot.slane %v2046_v62, %v3376_v32  ;;  %v2085_v54 = vrot.slane %v1747_v48, %v3376_v32  ;;  %v1705_v61 = vadd.f32 %v1704_v8, %v1703_v56  ;;  %v2104_v55 = vrot.slane %v1754_v13, %v3376_v32 }
 0x31f   :  { %v1675_v5 = vadd.f32 %v1674_v14, %v1673_v58  ;;  %1826 = vst.msk [vmem:[#allocation8 + $0x1] sm:$0x1] %vm3449_vm11, %v1621_v57  ;;  %v1730_v45 = vrot.slane %v1729_v9, 2  ;;  %2074 = vrot.lane.b32.xlu1 %v2073_v47, %s2548_s6  ;;  %vm1778_vm0 = vcmp.ge.s32.totalorder %v3628_v2, 32  ;;  %vm1779_vm12 = vcmp.lt.s32.totalorder %v3628_v2, 64 }
 0x320   :  { %2054 = vrot.lane.b32.xlu0 %v2053_v31, %s2549_s28  ;;  %v2092_v46 = vrot.slane %v2085_v54, %v3376_v32  ;;  %2000 = vst.msk [vmem:[#allocation8 + $0x4] sm:$0x1] %vm3449_vm11, %v1705_v61  ;;  %v2111_v39 = vrot.slane %v2104_v55, %v3376_v32  ;;  %vm3521_vm13 = vmand %vm1778_vm0, %vm1779_vm12  ;;  %vm1800_vm14 = vcmp.ge.s32.totalorder %v3628_v2, 64  ;;  %vm1801_vm15 = vcmp.lt.s32.totalorder %v3628_v2, 96 }
 0x321   :  { %v1676_v7 = vrot.slane %v1675_v5, 1  ;;  %v1731_v42 = vadd.f32 %v1730_v45, %v1729_v9  ;;  %vm1822_vm1 = vcmp.ge.s32.totalorder %v3628_v2, 96  ;;  %vm1823_vm2 = vcmp.lt.s32.totalorder %v3628_v2, 128  ;;  %vm3531_vm3 = vmand %vm1800_vm14, %vm1801_vm15 }
 0x322   :  { %vm3535_vm4 = vmand %vm1822_vm1, %vm1823_vm2 }
 0x323   :  { %v1677_v28 = vadd.f32 %v1676_v7, %v1675_v5  ;;  %v1732_v44 = vrot.slane %v1731_v42, 1  ;;  %2093 = vrot.lane.b32.xlu1 %v2092_v46, %s2550_s30 }
 0x325   :  { %1942 = vst.msk [vmem:[#allocation8 + $0x3] sm:$0x1] %vm3449_vm11, %v1677_v28  ;;  %v1733_v34 = vadd.f32 %v1732_v44, %v1731_v42 }
 0x327   :  { %2112 = vrot.lane.b32.xlu1 %v2111_v39, %s2549_s28  ;;  %2058 = vst.msk [vmem:[#allocation8 + $0x5] sm:$0x1] %vm3449_vm11, %v1733_v34 }
 0x361   :  { %v1776_v6 = vpop.permute.xlu1 %1775 }
 0x362   :  { %1781 = vst.msk [vmem:[#allocation8] sm:$0x1] %vm3521_vm13, %v1776_v6 }
 0x364   :  { %v1820_v32 = vpop.permute.xlu0 %1819 }
 0x36b   :  { %v1798_v40 = vpop.permute.xlu0 %1797 }
 0x36c   :  { %1803 = vst.msk [vmem:[#allocation8] sm:$0x1] %vm3531_vm3, %v1798_v40 }
 0x36d   :  { %1825 = vst.msk [vmem:[#allocation8] sm:$0x1] %vm3535_vm4, %v1820_v32 }
 0x36f   :  { %v1843_v17 = vpop.permute.xlu0 %1842 }
 0x370   :  { %1845 = vst.msk [vmem:[#allocation8 + $0x1] sm:$0x1] %vm3521_vm13, %v1843_v17 }
 0x371   :  { %v1881_v2 = vpop.permute.xlu1 %1880 }
 0x375   :  { %v1862_v10 = vpop.permute.xlu1 %1861 }
 0x376   :  { %1864 = vst.msk [vmem:[#allocation8 + $0x1] sm:$0x1] %vm3531_vm3, %v1862_v10 }
 0x377   :  { %1883 = vst.msk [vmem:[#allocation8 + $0x1] sm:$0x1] %vm3535_vm4, %v1881_v2  ;;  %v1939_v1 = vpop.permute.xlu0 %1938 }
 0x37a   :  { %v1901_v63 = vpop.permute.xlu1 %1900 }
 0x37b   :  { %1903 = vst.msk [vmem:[#allocation8 + $0x2] sm:$0x1] %vm3521_vm13, %v1901_v63 }
 0x37f   :  { %v1920_v4 = vpop.permute.xlu0 %1919  ;;  %v1959_v30 = vpop.permute.xlu1 %1958 }
 0x380   :  { %1922 = vst.msk [vmem:[#allocation8 + $0x2] sm:$0x1] %vm3531_vm3, %v1920_v4 }
 0x381   :  { %1961 = vst.msk [vmem:[#allocation8 + $0x3] sm:$0x1] %vm3521_vm13, %v1959_v30 }
 0x382   :  { %1941 = vst.msk [vmem:[#allocation8 + $0x2] sm:$0x1] %vm3535_vm4, %v1939_v1 }
 0x385   :  { %v1997_v20 = vpop.permute.xlu1 %1996 }
 0x387   :  { %v2017_v59 = vpop.permute.xlu0 %2016 }
 0x388   :  { %2019 = vst.msk [vmem:[#allocation8 + $0x4] sm:$0x1] %vm3521_vm13, %v2017_v59 }
 0x38b   :  { %v1978_v29 = vpop.permute.xlu1 %1977 }
 0x38c   :  { %1980 = vst.msk [vmem:[#allocation8 + $0x3] sm:$0x1] %vm3531_vm3, %v1978_v29 }
 0x38d   :  { %1999 = vst.msk [vmem:[#allocation8 + $0x3] sm:$0x1] %vm3535_vm4, %v1997_v20  ;;  %v2036_v11 = vpop.permute.xlu0 %2035 }
 0x38e   :  { %2038 = vst.msk [vmem:[#allocation8 + $0x4] sm:$0x1] %vm3531_vm3, %v2036_v11 }
 0x391   :  { %v2075_v33 = vpop.permute.xlu1 %2074 }
 0x392   :  { %v2055_v60 = vpop.permute.xlu0 %2054  ;;  %2077 = vst.msk [vmem:[#allocation8 + $0x5] sm:$0x1] %vm3521_vm13, %v2075_v33 }
 0x393   :  { %2057 = vst.msk [vmem:[#allocation8 + $0x4] sm:$0x1] %vm3535_vm4, %v2055_v60 }
 0x395   :  { %v2094_v52 = vpop.permute.xlu1 %2093 }
 0x396   :  { %2096 = vst.msk [vmem:[#allocation8 + $0x5] sm:$0x1] %vm3531_vm3, %v2094_v52 }
 0x399   :  { %v2113_v0 = vpop.permute.xlu1 %2112 }
 0x39a   :  { %2115 = vst.msk [vmem:[#allocation8 + $0x5] sm:$0x1] %vm3535_vm4, %v2113_v0 }
 0x39b   :  { %2526 = shalt.err (!%p2523_p6)
}
 0x39c   :  { %s2527_s14 = scalar_lea.hbm %s3593_s8, 96 }
 0x39d   :  { %p2528_p7 = scmp.ne.s32.totalorder %s3593_s8, %s2527_s14  ;;  %p2531_p8 = scmp.lt.u32.totalorder %s2527_s14, %s3593_s8 }
 0x39f   :  { %p2533_p9 = pnand %p2531_p8, %p2528_p7 }
 0x3a1   :  { %2536 = shalt.err (!%p2533_p9)
}
 0x3a2   :  { %2125 = dma.vmem_to_hbm [thread:$0]  %s2123_s10, 96, %s3593_s8, [#allocation5]  }
 0x3a3   :  { %2541 = dma.done.wait [#allocation5], 96  }
 0x3a4   :  { %2542 = vsyncadd [#allocation5], 4294967200 }
 0x3a5   :  { %2129 = vsyncpa [#allocation4], 1 }
 0x3a6   :  { %2130 = vsyncpa [#allocation7], 1 }
 0x3a7   :  { %2131 = vsyncpa [#allocation5], 1 }

</bundles_post_ra>
